<compile_context>
chip_gen: v7x
topology: tpu7x:2x2x1
jax: 0.10.0
libtpu: 0.0.40
codegen_flags: <defaults>
</compile_context>

<pallas_src>
import functools

import jax
import jax.numpy as jnp
from jax.experimental import pallas as pl
from jax.experimental.pallas import tpu as pltpu


def _round_up(x, m):
    return (x + m - 1) // m * m


def _tpu_vmem_capacity_bytes():
    try:
        return int(pltpu.get_tpu_info().vmem_capacity_bytes)
    except Exception:
        return 64 * 1024 * 1024          # conservative fallback (v7x physical)


_VMEM_CAP = _tpu_vmem_capacity_bytes()
# Leave headroom for compiler-internal scratch; cap at 100 MiB on 128 MiB parts.
_VMEM_LIMIT = int(min(_VMEM_CAP * 3 // 4, 100 * 1024 * 1024))
# Bigger q tiles on 128 MiB parts (v5e/v6e), tighter on v7x (64 MiB).
_DEFAULT_TQ = 512 if _VMEM_CAP > (96 << 20) else 256
_DEFAULT_TK = 256


def _plan_cell_tiles(n, tq_target, tk_target):
    """Tile plan over the cell axis -> (tq, tk, n_pad) with tq|n_pad, tk|n_pad.

    tk_target must be a multiple of 128 so the (1, 1, tk) quality-row block is
    lane aligned; when n <= tk_target we use one full-extent tile (rounded up
    to the sublane multiple of 8) so the lane dim equals the full array dim.
    """
    if n <= tk_target:
        t = _round_up(n, 8)
        return t, t, t
    n_pad = _round_up(n, tk_target)
    tk = tk_target
    tq = tq_target if (tq_target % tk == 0 and n_pad % tq_target == 0) else tk
    return tq, tk, n_pad


# --------------------------- fused MLP kernel --------------------------------

def _fused_mlp_kernel(*refs, n_layers):
    """One M-tile of: denoise (residual MLP), qualify (MLP->1), embed (MLP).

    All branches read the same raw-expression tile once; hidden activations
    stay in VMEM/vregs.  MXU operands are bf16 with f32 accumulation; tanh and
    adds stay f32.
    """
    n_den, n_qual, n_emb = n_layers
    it = iter(refs)
    x_ref = next(it)

    def take(n):
        return [(next(it), next(it)) for _ in range(n)]

    den_layers = take(n_den)
    qual_layers = take(n_qual)
    emb_layers = take(n_emb)
    den_o = next(it)
    qual_o = next(it)
    emb_o = next(it)

    x = x_ref[...].astype(jnp.float32)           # (TM, G)

    def run_mlp(h, layers, tanh_last):
        for i, (w_ref, b_ref) in enumerate(layers):
            y = jnp.dot(h.astype(jnp.bfloat16), w_ref[...],
                        preferred_element_type=jnp.float32)
            y = y + b_ref[...].astype(jnp.float32)
            h = jnp.tanh(y) if (i < len(layers) - 1 or tanh_last) else y
        return h

    # Denoise: residual MLP back to d_gene (residual add kept in f32).
    den_o[...] = (run_mlp(x, den_layers, False) + x).astype(den_o.dtype)

    # Qualify: hidden layers (each tanh-activated), then the width-1 head.
    # The (TM, 1) result is transposed in-kernel (cheap XLU) so the output is
    # a lane-dense (1, TM) row -> unmasked stores, and the (B, 1, N) layout
    # CellSmooth wants is a free reshape in the wrapper.
    hq = run_mlp(x, qual_layers[:-1], True)
    wq_ref, bq_ref = qual_layers[-1]
    yq = jnp.dot(hq.astype(jnp.bfloat16), wq_ref[...],
                 preferred_element_type=jnp.float32)
    yq = yq + bq_ref[...].astype(jnp.float32)            # (TM, 1)
    qual_o[...] = jnp.transpose(yq).astype(qual_o.dtype)  # (1, TM)

    # Embed.
    emb_o[...] = run_mlp(x, emb_layers, False).astype(emb_o.dtype)


def fused_mlp_pallas(x2d, den_layers, qual_layers, emb_layers, *, tm_target=1024):
    """x2d: (M, G).  Returns (denoised (M, G), quality_row (1, M),
    embedding (M, E)), all float32."""
    M, G = x2d.shape
    tm = min(tm_target, _round_up(M, 8))
    m_pad = _round_up(M, tm)
    x_in = jnp.pad(x2d, ((0, m_pad - M), (0, 0))) if m_pad != M else x2d

    operands = [x_in]
    in_specs = [pl.BlockSpec((tm, G), lambda i: (i, 0))]
    counts = []
    for layers in (den_layers, qual_layers, emb_layers):
        counts.append(len(layers))
        for w, b in layers:
            operands.append(w.astype(jnp.bfloat16))   # bf16 weights: half the DMA
            operands.append(b)                        # f32 bias
            in_specs.append(pl.BlockSpec(w.shape, lambda i: (0, 0)))  # resident
            in_specs.append(pl.BlockSpec(b.shape, lambda i: (0, 0)))

    d_den = den_layers[-1][0].shape[1]
    d_emb = emb_layers[-1][0].shape[1]
    out_shape = (jax.ShapeDtypeStruct((m_pad, d_den), jnp.float32),
                 jax.ShapeDtypeStruct((1, m_pad), jnp.float32),   # lane-dense
                 jax.ShapeDtypeStruct((m_pad, d_emb), jnp.float32))
    out_specs = (pl.BlockSpec((tm, d_den), lambda i: (i, 0)),
                 pl.BlockSpec((1, tm), lambda i: (0, i)),
                 pl.BlockSpec((tm, d_emb), lambda i: (i, 0)))

    den, qual, emb = pl.pallas_call(
        functools.partial(_fused_mlp_kernel, n_layers=tuple(counts)),
        out_shape=out_shape,
        grid=(m_pad // tm,),
        in_specs=in_specs,
        out_specs=out_specs,
        compiler_params=pltpu.CompilerParams(
            dimension_semantics=("parallel",),
            vmem_limit_bytes=_VMEM_LIMIT),
    )(*operands)
    return den[:M], qual[:, :M], emb[:M]


# ----------------------- CellSmooth (online softmax) -------------------------

def _smooth_kernel(q_ref, k_ref, qual_ref, v_ref, o_ref, m_sc, l_sc, acc_sc):
    ki = pl.program_id(2)

    @pl.when(ki == 0)
    def _():
        m_sc[...] = jnp.full_like(m_sc, -jnp.inf)
        l_sc[...] = jnp.zeros_like(l_sc)
        acc_sc[...] = jnp.zeros_like(acc_sc)

    q = q_ref[0]           # (Tq, E) f32
    k = k_ref[0]           # (Tk, E) f32
    qual = qual_ref[0]     # (1, Tk) f32; padded keys carry -1e30 -> weight 0

    # ||q-k||^2 = |q|^2 + |k|^2 - 2 q.k.  Gram at HIGHEST precision so the
    # cancellation-sensitive cdist is genuinely f32 (E is tiny -> cheap).
    q_sq = jnp.sum(q * q, axis=-1, keepdims=True)                    # (Tq, 1)
    k_sq = jnp.sum(k * k, axis=-1, keepdims=True)                    # (Tk, 1)
    gram = jax.lax.dot_general(q, k, (((1,), (1,)), ((), ())),
                               precision=jax.lax.Precision.HIGHEST,
                               preferred_element_type=jnp.float32)   # (Tq, Tk)
    d2 = q_sq + jnp.transpose(k_sq) - 2.0 * gram
    dist = jnp.sqrt(jnp.maximum(d2, 0.0))
    s = qual - dist                                                  # logits

    m_prev = m_sc[...]
    m_new = jnp.maximum(m_prev, jnp.max(s, axis=-1, keepdims=True))
    alpha = jnp.exp(m_prev - m_new)
    p = jnp.exp(s - m_new)
    l_sc[...] = alpha * l_sc[...] + jnp.sum(p, axis=-1, keepdims=True)
    acc_sc[...] = alpha * acc_sc[...] + jnp.dot(
        p.astype(jnp.bfloat16), v_ref[0], preferred_element_type=jnp.float32)
    m_sc[...] = m_new

    @pl.when(ki == pl.num_programs(2) - 1)
    def _():
        o_ref[0] = (acc_sc[...] * pl.reciprocal(l_sc[...], approx=True)
                    ).astype(o_ref.dtype)


def smooth_pallas(denoised_b, enc_f32, qual_row, *, tq, tk):
    """softmax(-cdist(enc, enc) + quality^T, -1) @ denoised, tiled over
    (batch, q tile, k tile) with an online softmax.

    denoised_b: (B, Np, G) bf16 (rows beyond the true N are zero)
    enc_f32:    (B, Np, E) f32
    qual_row:   (B, 1, Np) f32 with -1e30 at padded cells (masks them out)
    Returns (B, Np, G) f32.
    """
    B, Np, G = denoised_b.shape
    E = enc_f32.shape[-1]
    return pl.pallas_call(
        _smooth_kernel,
        out_shape=jax.ShapeDtypeStruct((B, Np, G), jnp.float32),
        grid=(B, Np // tq, Np // tk),
        in_specs=[pl.BlockSpec((1, tq, E), lambda b, qi, ki: (b, qi, 0)),
                  pl.BlockSpec((1, tk, E), lambda b, qi, ki: (b, ki, 0)),
                  pl.BlockSpec((1, 1, tk), lambda b, qi, ki: (b, 0, ki)),
                  pl.BlockSpec((1, tk, G), lambda b, qi, ki: (b, ki, 0))],
        out_specs=pl.BlockSpec((1, tq, G), lambda b, qi, ki: (b, qi, 0)),
        scratch_shapes=[pltpu.VMEM((tq, 1), jnp.float32),
                        pltpu.VMEM((tq, 1), jnp.float32),
                        pltpu.VMEM((tq, G), jnp.float32)],
        compiler_params=pltpu.CompilerParams(
            dimension_semantics=("parallel", "parallel", "arbitrary"),
            vmem_limit_bytes=_VMEM_LIMIT),
    )(enc_f32, enc_f32, qual_row, denoised_b)


# ----------------------------- CellInteract ----------------------------------

def _interact_kernel(expr_ref, exprq_ref, enc_ref, encq_ref, t_ref, r_ref,
                     o_ref, qt_sc, ce_sc, acc_sc, *, scale):
    h = pl.program_id(2)
    ki = pl.program_id(3)
    last_h = pl.num_programs(2) - 1
    last_k = pl.num_programs(3) - 1

    @pl.when((h == 0) & (ki == 0))
    def _():
        acc_sc[...] = jnp.zeros_like(acc_sc)

    @pl.when(ki == 0)
    def _():
        ce_sc[...] = jnp.zeros_like(ce_sc)
        # q-side embedding transform: computed once per (q-tile, head).
        qt_sc[...] = jnp.dot(encq_ref[0], t_ref[0],
                             preferred_element_type=jnp.float32)      # (Tq, E)

    # z = (enc_q @ T) @ enc_k^T for this key tile; padded key rows of expr are
    # zero, so their (garbage-sigmoid) columns contribute nothing.
    z = jax.lax.dot_general(qt_sc[...].astype(jnp.bfloat16), enc_ref[0],
                            (((1,), (1,)), ((), ())),
                            preferred_element_type=jnp.float32)        # (Tq, Tk)
    ci = jax.nn.sigmoid(z)                                             # EUP
    ce_sc[...] += jnp.dot(ci.astype(jnp.bfloat16), expr_ref[0],
                          preferred_element_type=jnp.float32)          # (Tq, G)

    @pl.when(ki == last_k)
    def _():
        acc_sc[...] += jnp.dot(ce_sc[...].astype(jnp.bfloat16), r_ref[0],
                               preferred_element_type=jnp.float32)

    @pl.when((h == last_h) & (ki == last_k))
    def _():
        # final = smoothed + (sum_h ci_h @ expr @ r_h) / (n_cells * n_heads)
        o_ref[0] = (exprq_ref[0] + acc_sc[...] * scale).astype(o_ref.dtype)


def interact_pallas(smoothed_f, smoothed_b, enc_b, transforms, gene_responses,
                    *, n_true, tq, tk):
    """smoothed_f: (B, Np, G) f32 (residual source, padded rows arbitrary)
    smoothed_b:   (B, Np, G) bf16 (key stream; padded rows MUST be zero)
    enc_b:        (B, Np, E) bf16
    Returns (B, Np, G) f32."""
    B, Np, G = smoothed_f.shape
    E = enc_b.shape[-1]
    H = transforms.shape[0]
    scale = 1.0 / (float(n_true) * float(H))       # folds /n_cells and /n_heads
    t_b = transforms.astype(jnp.bfloat16)
    r_b = gene_responses.astype(jnp.bfloat16)
    return pl.pallas_call(
        functools.partial(_interact_kernel, scale=scale),
        out_shape=jax.ShapeDtypeStruct((B, Np, G), jnp.float32),
        grid=(B, Np // tq, H, Np // tk),
        in_specs=[
            pl.BlockSpec((1, tk, G), lambda b, qi, h, ki: (b, ki, 0)),  # expr keys
            pl.BlockSpec((1, tq, G), lambda b, qi, h, ki: (b, qi, 0)),  # residual
            pl.BlockSpec((1, tk, E), lambda b, qi, h, ki: (b, ki, 0)),  # enc keys
            pl.BlockSpec((1, tq, E), lambda b, qi, h, ki: (b, qi, 0)),  # enc q
            pl.BlockSpec((1, E, E), lambda b, qi, h, ki: (h, 0, 0)),    # transform
            pl.BlockSpec((1, G, G), lambda b, qi, h, ki: (h, 0, 0)),    # response
        ],
        out_specs=pl.BlockSpec((1, tq, G), lambda b, qi, h, ki: (b, qi, 0)),
        scratch_shapes=[pltpu.VMEM((tq, E), jnp.float32),
                        pltpu.VMEM((tq, G), jnp.float32),
                        pltpu.VMEM((tq, G), jnp.float32)],
        compiler_params=pltpu.CompilerParams(
            dimension_semantics=("parallel", "parallel", "arbitrary", "arbitrary"),
            vmem_limit_bytes=_VMEM_LIMIT),
    )(smoothed_b, smoothed_f, enc_b, enc_b, t_b, r_b)


# ------------------------------ Model wrapper ---------------------------------

def init_mlp_params(key, dims, scale=0.1):
    layers = []
    for i in range(len(dims) - 1):
        key, kw, kb = jax.random.split(key, 3)
        w = scale * jax.random.normal(kw, (dims[i], dims[i + 1]), jnp.float32)
        b = scale * jax.random.normal(kb, (1, dims[i + 1]), jnp.float32)
        layers.append((w, b))
    return layers, key


def init_model(key, *, d_gene, d_denoise, d_embed, d_quality, n_heads):
    denoise, key = init_mlp_params(key, [d_gene] + d_denoise + [d_gene])
    embed, key = init_mlp_params(key, [d_gene] + d_embed)
    qualify, key = init_mlp_params(key, [d_gene] + d_quality + [1])
    key, kt, kr = jax.random.split(key, 3)
    transforms = jax.random.normal(kt, (n_heads, d_embed[-1], d_embed[-1]),
                                   jnp.float32)
    gene_responses = jax.random.normal(kr, (n_heads, d_gene, d_gene),
                                       jnp.float32)
    return dict(denoise=denoise, embed=embed, qualify=qualify,
                transforms=transforms, gene_responses=gene_responses)


def model_forward(params, raw_expr, interact=False, tq_target=None, tk_target=None):
    B, N, G = raw_expr.shape
    tq_target = _DEFAULT_TQ if tq_target is None else tq_target
    tk_target = _DEFAULT_TK if tk_target is None else tk_target

    den2d, qual_row2d, emb2d = fused_mlp_pallas(
        raw_expr.reshape(B * N, G),
        params["denoise"], params["qualify"], params["embed"])
    denoised = den2d.reshape(B, N, G)
    E = emb2d.shape[-1]
    embedding = emb2d.reshape(B, N, E)
    quality_row = qual_row2d.reshape(B, 1, N)     # lane-dense -> free reshape

    tq, tk, n_pad = _plan_cell_tiles(N, tq_target, tk_target)
    pad = n_pad - N

    def pad_cells(x):
        return x if pad == 0 else jnp.pad(x, ((0, 0), (0, pad), (0, 0)))

    # Big streamed operands go in as bf16 (half the HBM traffic on the tensors
    # re-streamed once per q-tile); the tiny E-wide embedding stays f32 for the
    # cancellation-sensitive cdist; padded keys are masked via quality=-1e30.
    den_b = pad_cells(denoised.astype(jnp.bfloat16))
    enc_f = pad_cells(embedding)
    qual_p = quality_row if pad == 0 else jnp.pad(
        quality_row, ((0, 0), (0, 0), (0, pad)), constant_values=-1e30)

    smoothed_pad = smooth_pallas(den_b, enc_f, qual_p, tq=tq, tk=tk)
    smoothed = smoothed_pad[:, :N]
    if not interact:
        return denoised, smoothed

    smoothed_b = pad_cells(smoothed.astype(jnp.bfloat16))  # zero padded key rows
    smoothed_f = pad_cells(smoothed)
    enc_b = pad_cells(embedding.astype(jnp.bfloat16))
    final_pad = interact_pallas(smoothed_f, smoothed_b, enc_b,
                                params["transforms"], params["gene_responses"],
                                n_true=N, tq=tq, tk=tk)
    return denoised, smoothed, final_pad[:, :N]


# --------------------------- pure-JAX reference -------------------------------

def model_forward_ref(params, x, interact=False):
    def mlp(h, ps, residual=False):
        out = h
        for i, (w, b) in enumerate(ps):
            out = out @ w + b[0]
            if i < len(ps) - 1:
                out = jnp.tanh(out)
        return out + h if residual else out

    denoised = mlp(x, params["denoise"], residual=True)
    quality = mlp(x, params["qualify"])
    emb = mlp(x, params["embed"])

    sq = jnp.sum(emb * emb, axis=-1, keepdims=True)
    d2 = sq + jnp.swapaxes(sq, -1, -2) - 2.0 * (emb @ jnp.swapaxes(emb, -1, -2))
    dist = jnp.sqrt(jnp.maximum(d2, 0.0))
    logits = -dist + jnp.swapaxes(quality, -1, -2)
    m = jnp.max(logits, axis=-1, keepdims=True)
    p = jnp.exp(logits - m)
    sim = p / jnp.sum(p, axis=-1, keepdims=True)
    smoothed = sim @ denoised
    if not interact:
        return denoised, smoothed

    N = smoothed.shape[1]
    H = params["transforms"].shape[0]
    acc = jnp.zeros_like(smoothed)
    for h in range(H):
        t = params["transforms"][h]
        r = params["gene_responses"][h]
        ci = jax.nn.sigmoid(emb @ t @ jnp.swapaxes(emb, -1, -2))
        acc = acc + (ci @ smoothed @ r) / N
    final = smoothed + acc / H
    return denoised, smoothed, final


# ---------------------------------- main --------------------------------------

def _check(name, got, want, atol, rtol):
    if not bool(jnp.allclose(got, want, atol=atol, rtol=rtol)):
        err = float(jnp.max(jnp.abs(got - want)))
        raise AssertionError(f"{name} mismatch (max abs err {err:.3e})")


def _run_case(key, *, B, N, G, d_denoise, d_embed, d_quality, n_heads,
              tq_target=None, tk_target=None):
    key, kx = jax.random.split(key)
    raw = jax.random.normal(kx, (B, N, G), jnp.float32)
    params = init_model(key, d_gene=G, d_denoise=d_denoise, d_embed=d_embed,
                        d_quality=d_quality, n_heads=n_heads)

    fwd = jax.jit(model_forward,
                  static_argnames=("interact", "tq_target", "tk_target"))
    den, smo, fin = fwd(params, raw, interact=True,
                        tq_target=tq_target, tk_target=tk_target)
    jax.block_until_ready((den, smo, fin))

    # f32 gold reference (HIGHEST so XLA's default bf16 matmuls don't leak in).
    with jax.default_matmul_precision("highest"):
        d_ref, s_ref, f_ref = model_forward_ref(params, raw, interact=True)
    # Tolerances absorb bf16 MXU operands (f32 accumulation) inside the kernels.
    _check("denoised", den, d_ref, 1e-2, 1e-2)
    _check("smoothed", smo, s_ref, 2e-2, 2e-2)
    _check("final", fin, f_ref, 1e-1, 3e-2)

    # Also exercise the default (interact=False) path.
    d2_, s2_ = fwd(params, raw, interact=False,
                   tq_target=tq_target, tk_target=tk_target)
    jax.block_until_ready((d2_, s2_))


if __name__ == "__main__":
    key = jax.random.PRNGKey(0)
    k1, k2 = jax.random.split(key)

    # Case 1: small shapes, single-tile path.
    _run_case(k1, B=2, N=16, G=32, d_denoise=[16], d_embed=[24, 16],
              d_quality=[8], n_heads=2)

    # Case 2: ragged cell count with forced small tiles -> exercises cell-axis
    # padding + key masking, multi-tile online softmax, and the k-tiled
    # interact accumulation.
    _run_case(k2, B=2, N=200, G=32, d_denoise=[16], d_embed=[24, 16],
              d_quality=[8], n_heads=2, tq_target=128, tk_target=128)

    print("KERNEL_OK")
</pallas_src>

<mosaic_0001>
module attributes {stable_mosaic.version = 11 : i64} {
  func.func @_smooth_kernel(%arg0: i32, %arg1: i32, %arg2: i32, %arg3: memref<1x16x16xf32, #tpu.memory_space<vmem>>, %arg4: memref<1x16x16xf32, #tpu.memory_space<vmem>>, %arg5: memref<1x1x16xf32, #tpu.memory_space<vmem>>, %arg6: memref<1x16x32xbf16, #tpu.memory_space<vmem>>, %arg7: memref<1x16x32xf32, #tpu.memory_space<vmem>>, %arg8: memref<16x1xf32, #tpu.memory_space<vmem>>, %arg9: memref<16x1xf32, #tpu.memory_space<vmem>>, %arg10: memref<16x32xf32, #tpu.memory_space<vmem>>) attributes {dimension_semantics = [#tpu.dimension_semantics<parallel>, #tpu.dimension_semantics<parallel>, #tpu.dimension_semantics<arbitrary>], iteration_bounds = array<i64: 2, 1, 1>, scalar_prefetch = 0 : i64, scratch_operands = 3 : i64, tpu.core_type = #tpu.core_type<tc>, window_params = [{transform_indices = @transform_0, window_bounds = array<i64: 1, 16, 16>}, {transform_indices = @transform_1, window_bounds = array<i64: 1, 16, 16>}, {transform_indices = @transform_2, window_bounds = array<i64: 1, 1, 16>}, {transform_indices = @transform_3, window_bounds = array<i64: 1, 16, 32>}, {transform_indices = @transform_4, window_bounds = array<i64: 1, 16, 32>}]} {
    %c0_i32 = arith.constant 0 : i32
    %0 = arith.cmpi eq, %arg2, %c0_i32 : i32
    %1 = arith.extui %0 : i1 to i32
    %c0_i32_0 = arith.constant 0 : i32
    %2 = arith.cmpi ne, %1, %c0_i32_0 : i32
    scf.if %2 {
      %cst_33 = arith.constant 0xFF800000 : f32
      %56 = vector.broadcast %cst_33 : f32 to vector<16x1xf32>
      %c0_34 = arith.constant 0 : index
      %c0_35 = arith.constant 0 : index
      %57 = vector.load %arg8[%c0_34, %c0_35] : memref<16x1xf32, #tpu.memory_space<vmem>>, vector<16x1xf32>
      tpu.vector_store %arg8[%c0_34, %c0_35], %56 {strides = array<i32>} : memref<16x1xf32, #tpu.memory_space<vmem>>, vector<16x1xf32>,
      %cst_36 = arith.constant 0.000000e+00 : f32
      %58 = vector.broadcast %cst_36 : f32 to vector<16x1xf32>
      %c0_37 = arith.constant 0 : index
      %c0_38 = arith.constant 0 : index
      %59 = vector.load %arg9[%c0_37, %c0_38] : memref<16x1xf32, #tpu.memory_space<vmem>>, vector<16x1xf32>
      tpu.vector_store %arg9[%c0_37, %c0_38], %58 {strides = array<i32>} : memref<16x1xf32, #tpu.memory_space<vmem>>, vector<16x1xf32>,
      %cst_39 = arith.constant 0.000000e+00 : f32
      %60 = vector.broadcast %cst_39 : f32 to vector<16x32xf32>
      %c0_40 = arith.constant 0 : index
      %c0_41 = arith.constant 0 : index
      %61 = vector.load %arg10[%c0_40, %c0_41] : memref<16x32xf32, #tpu.memory_space<vmem>>, vector<16x32xf32>
      tpu.vector_store %arg10[%c0_40, %c0_41], %60 {strides = array<i32>} : memref<16x32xf32, #tpu.memory_space<vmem>>, vector<16x32xf32>,
    } else {
    }
    %c0 = arith.constant 0 : index
    %c0_1 = arith.constant 0 : index
    %c0_2 = arith.constant 0 : index
    %3 = vector.load %arg3[%c0, %c0_1, %c0_2] : memref<1x16x16xf32, #tpu.memory_space<vmem>>, vector<1x16x16xf32>
    %4 = vector.shape_cast %3 : vector<1x16x16xf32> to vector<16x16xf32>
    %c0_3 = arith.constant 0 : index
    %c0_4 = arith.constant 0 : index
    %c0_5 = arith.constant 0 : index
    %5 = vector.load %arg4[%c0_3, %c0_4, %c0_5] : memref<1x16x16xf32, #tpu.memory_space<vmem>>, vector<1x16x16xf32>
    %6 = vector.shape_cast %5 : vector<1x16x16xf32> to vector<16x16xf32>
    %c0_6 = arith.constant 0 : index
    %c0_7 = arith.constant 0 : index
    %c0_8 = arith.constant 0 : index
    %7 = vector.load %arg5[%c0_6, %c0_7, %c0_8] : memref<1x1x16xf32, #tpu.memory_space<vmem>>, vector<1x1x16xf32>
    %8 = vector.shape_cast %7 : vector<1x1x16xf32> to vector<1x16xf32>
    %9 = arith.mulf %4, %4 : vector<16x16xf32>
    %cst = arith.constant dense<0.000000e+00> : vector<16xf32>
    %10 = vector.multi_reduction <add>, %9, %cst [1] : vector<16x16xf32> to vector<16xf32>
    %11 = vector.shape_cast %10 : vector<16xf32> to vector<16x1xf32>
    %12 = arith.mulf %6, %6 : vector<16x16xf32>
    %cst_9 = arith.constant dense<0.000000e+00> : vector<16xf32>
    %13 = vector.multi_reduction <add>, %12, %cst_9 [1] : vector<16x16xf32> to vector<16xf32>
    %14 = vector.shape_cast %13 : vector<16xf32> to vector<16x1xf32>
    %cst_10 = arith.constant dense<0.000000e+00> : vector<16x16xf32>
    %15 = tpu.matmul %4, %6, %cst_10 {dimension_numbers = #tpu.dot_dimension_numbers<[1], [1], [0], [0], [0, 0, 1, 0], [], []>, precision = #tpu.contract_precision<fp32>} : vector<16x16xf32>, vector<16x16xf32>, vector<16x16xf32> -> vector<16x16xf32>
    %16 = tpu.transpose %14, [1, 0] : vector<16x1xf32> -> vector<1x16xf32>
    %17 = vector.broadcast %11 : vector<16x1xf32> to vector<16x16xf32>
    %18 = vector.broadcast %16 : vector<1x16xf32> to vector<16x16xf32>
    %19 = arith.addf %17, %18 : vector<16x16xf32>
    %cst_11 = arith.constant 2.000000e+00 : f32
    %20 = vector.broadcast %cst_11 : f32 to vector<16x16xf32>
    %21 = arith.mulf %20, %15 : vector<16x16xf32>
    %22 = arith.subf %19, %21 : vector<16x16xf32>
    %cst_12 = arith.constant 0.000000e+00 : f32
    %23 = vector.broadcast %cst_12 : f32 to vector<16x16xf32>
    %24 = arith.maximumf %22, %23 : vector<16x16xf32>
    %25 = math.sqrt %24 : vector<16x16xf32>
    %26 = vector.broadcast %8 : vector<1x16xf32> to vector<16x16xf32>
    %27 = arith.subf %26, %25 : vector<16x16xf32>
    %c0_13 = arith.constant 0 : index
    %c0_14 = arith.constant 0 : index
    %28 = vector.load %arg8[%c0_13, %c0_14] : memref<16x1xf32, #tpu.memory_space<vmem>>, vector<16x1xf32>
    %cst_15 = arith.constant dense<0xFF800000> : vector<16xf32>
    %29 = vector.multi_reduction <maximumf>, %27, %cst_15 [1] : vector<16x16xf32> to vector<16xf32>
    %30 = vector.shape_cast %29 : vector<16xf32> to vector<16x1xf32>
    %31 = arith.maximumf %28, %30 : vector<16x1xf32>
    %32 = arith.subf %28, %31 : vector<16x1xf32>
    %33 = math.exp %32 : vector<16x1xf32>
    %34 = vector.broadcast %31 : vector<16x1xf32> to vector<16x16xf32>
    %35 = arith.subf %27, %34 : vector<16x16xf32>
    %36 = math.exp %35 : vector<16x16xf32>
    %c0_16 = arith.constant 0 : index
    %c0_17 = arith.constant 0 : index
    %37 = vector.load %arg9[%c0_16, %c0_17] : memref<16x1xf32, #tpu.memory_space<vmem>>, vector<16x1xf32>
    %38 = arith.mulf %33, %37 : vector<16x1xf32>
    %cst_18 = arith.constant dense<0.000000e+00> : vector<16xf32>
    %39 = vector.multi_reduction <add>, %36, %cst_18 [1] : vector<16x16xf32> to vector<16xf32>
    %40 = vector.shape_cast %39 : vector<16xf32> to vector<16x1xf32>
    %41 = arith.addf %38, %40 : vector<16x1xf32>
    %c0_19 = arith.constant 0 : index
    %c0_20 = arith.constant 0 : index
    %42 = vector.load %arg9[%c0_19, %c0_20] : memref<16x1xf32, #tpu.memory_space<vmem>>, vector<16x1xf32>
    tpu.vector_store %arg9[%c0_19, %c0_20], %41 {strides = array<i32>} : memref<16x1xf32, #tpu.memory_space<vmem>>, vector<16x1xf32>,
    %c0_21 = arith.constant 0 : index
    %c0_22 = arith.constant 0 : index
    %43 = vector.load %arg10[%c0_21, %c0_22] : memref<16x32xf32, #tpu.memory_space<vmem>>, vector<16x32xf32>
    %44 = vector.broadcast %33 : vector<16x1xf32> to vector<16x32xf32>
    %45 = arith.mulf %44, %43 : vector<16x32xf32>
    %46 = arith.truncf %36 : vector<16x16xf32> to vector<16x16xbf16>
    %c0_23 = arith.constant 0 : index
    %c0_24 = arith.constant 0 : index
    %c0_25 = arith.constant 0 : index
    %47 = vector.load %arg6[%c0_23, %c0_24, %c0_25] : memref<1x16x32xbf16, #tpu.memory_space<vmem>>, vector<1x16x32xbf16>
    %48 = vector.shape_cast %47 : vector<1x16x32xbf16> to vector<16x32xbf16>
    %cst_26 = arith.constant dense<0.000000e+00> : vector<16x32xf32>
    %49 = tpu.matmul %46, %48, %cst_26 {dimension_numbers = #tpu.dot_dimension_numbers<[1], [0], [0], [1], [0, 0, 1, 1], [], []>} : vector<16x16xbf16>, vector<16x32xbf16>, vector<16x32xf32> -> vector<16x32xf32>
    %50 = arith.addf %45, %49 : vector<16x32xf32>
    %c0_27 = arith.constant 0 : index
    %c0_28 = arith.constant 0 : index
    %51 = vector.load %arg10[%c0_27, %c0_28] : memref<16x32xf32, #tpu.memory_space<vmem>>, vector<16x32xf32>
    tpu.vector_store %arg10[%c0_27, %c0_28], %50 {strides = array<i32>} : memref<16x32xf32, #tpu.memory_space<vmem>>, vector<16x32xf32>,
    %c0_29 = arith.constant 0 : index
    %c0_30 = arith.constant 0 : index
    %52 = vector.load %arg8[%c0_29, %c0_30] : memref<16x1xf32, #tpu.memory_space<vmem>>, vector<16x1xf32>
    tpu.vector_store %arg8[%c0_29, %c0_30], %31 {strides = array<i32>} : memref<16x1xf32, #tpu.memory_space<vmem>>, vector<16x1xf32>,
    %c0_i32_31 = arith.constant 0 : i32
    %53 = arith.cmpi eq, %arg2, %c0_i32_31 : i32
    %54 = arith.extui %53 : i1 to i32
    %c0_i32_32 = arith.constant 0 : i32
    %55 = arith.cmpi ne, %54, %c0_i32_32 : i32
    scf.if %55 {
      %c0_33 = arith.constant 0 : index
      %c0_34 = arith.constant 0 : index
      %56 = vector.load %arg10[%c0_33, %c0_34] : memref<16x32xf32, #tpu.memory_space<vmem>>, vector<16x32xf32>
      %c0_35 = arith.constant 0 : index
      %c0_36 = arith.constant 0 : index
      %57 = vector.load %arg9[%c0_35, %c0_36] : memref<16x1xf32, #tpu.memory_space<vmem>>, vector<16x1xf32>
      %58 = tpu.reciprocal %57 {approx = true} : vector<16x1xf32> -> vector<16x1xf32>
      %59 = vector.broadcast %58 : vector<16x1xf32> to vector<16x32xf32>
      %60 = arith.mulf %56, %59 : vector<16x32xf32>
      %c0_37 = arith.constant 0 : index
      %c0_38 = arith.constant 0 : index
      %c0_39 = arith.constant 0 : index
      %61 = vector.load %arg7[%c0_37, %c0_38, %c0_39] : memref<1x16x32xf32, #tpu.memory_space<vmem>>, vector<1x16x32xf32>
      %62 = vector.shape_cast %61 : vector<1x16x32xf32> to vector<16x32xf32>
      %63 = vector.shape_cast %60 : vector<16x32xf32> to vector<1x16x32xf32>
      tpu.vector_store %arg7[%c0_37, %c0_38, %c0_39], %63 {strides = array<i32>} : memref<1x16x32xf32, #tpu.memory_space<vmem>>, vector<1x16x32xf32>,
    } else {
    }
    return
  }
  func.func @transform_0(%arg0: i32, %arg1: i32, %arg2: i32) -> (i32, i32, i32) {
    %c0_i32 = arith.constant 0 : i32
    %c0_i32_0 = arith.constant 0 : i32
    return %arg0, %arg1, %c0_i32 : i32, i32, i32
  }
  func.func @transform_1(%arg0: i32, %arg1: i32, %arg2: i32) -> (i32, i32, i32) {
    %c0_i32 = arith.constant 0 : i32
    %c0_i32_0 = arith.constant 0 : i32
    return %arg0, %arg2, %c0_i32 : i32, i32, i32
  }
  func.func @transform_2(%arg0: i32, %arg1: i32, %arg2: i32) -> (i32, i32, i32) {
    %c0_i32 = arith.constant 0 : i32
    %c0_i32_0 = arith.constant 0 : i32
    return %arg0, %c0_i32, %arg2 : i32, i32, i32
  }
  func.func @transform_3(%arg0: i32, %arg1: i32, %arg2: i32) -> (i32, i32, i32) {
    %c0_i32 = arith.constant 0 : i32
    %c0_i32_0 = arith.constant 0 : i32
    return %arg0, %arg2, %c0_i32 : i32, i32, i32
  }
  func.func @transform_4(%arg0: i32, %arg1: i32, %arg2: i32) -> (i32, i32, i32) {
    %c0_i32 = arith.constant 0 : i32
    %c0_i32_0 = arith.constant 0 : i32
    return %arg0, %arg1, %c0_i32 : i32, i32, i32
  }
}

module attributes {stable_mosaic.version = 11 : i64} {
  func.func @_fused_mlp_kernel(%arg0: i32, %arg1: memref<32x32xf32, #tpu.memory_space<vmem>>, %arg2: memref<32x16xbf16, #tpu.memory_space<vmem>>, %arg3: memref<1x16xf32, #tpu.memory_space<vmem>>, %arg4: memref<16x32xbf16, #tpu.memory_space<vmem>>, %arg5: memref<1x32xf32, #tpu.memory_space<vmem>>, %arg6: memref<32x8xbf16, #tpu.memory_space<vmem>>, %arg7: memref<1x8xf32, #tpu.memory_space<vmem>>, %arg8: memref<8x1xbf16, #tpu.memory_space<vmem>>, %arg9: memref<1x1xf32, #tpu.memory_space<vmem>>, %arg10: memref<32x24xbf16, #tpu.memory_space<vmem>>, %arg11: memref<1x24xf32, #tpu.memory_space<vmem>>, %arg12: memref<24x16xbf16, #tpu.memory_space<vmem>>, %arg13: memref<1x16xf32, #tpu.memory_space<vmem>>, %arg14: memref<32x32xf32, #tpu.memory_space<vmem>>, %arg15: memref<1x32xf32, #tpu.memory_space<vmem>>, %arg16: memref<32x16xf32, #tpu.memory_space<vmem>>) attributes {dimension_semantics = [#tpu.dimension_semantics<parallel>], iteration_bounds = array<i64: 1>, scalar_prefetch = 0 : i64, scratch_operands = 0 : i64, tpu.core_type = #tpu.core_type<tc>, window_params = [{transform_indices = @transform_0, window_bounds = array<i64: 32, 32>}, {pipeline_mode = #tpu.pipeline_mode<synchronous>, transform_indices = @transform_1, window_bounds = array<i64: 32, 16>}, {pipeline_mode = #tpu.pipeline_mode<synchronous>, transform_indices = @transform_2, window_bounds = array<i64: 1, 16>}, {pipeline_mode = #tpu.pipeline_mode<synchronous>, transform_indices = @transform_3, window_bounds = array<i64: 16, 32>}, {pipeline_mode = #tpu.pipeline_mode<synchronous>, transform_indices = @transform_4, window_bounds = array<i64: 1, 32>}, {pipeline_mode = #tpu.pipeline_mode<synchronous>, transform_indices = @transform_5, window_bounds = array<i64: 32, 8>}, {pipeline_mode = #tpu.pipeline_mode<synchronous>, transform_indices = @transform_6, window_bounds = array<i64: 1, 8>}, {pipeline_mode = #tpu.pipeline_mode<synchronous>, transform_indices = @transform_7, window_bounds = array<i64: 8, 1>}, {pipeline_mode = #tpu.pipeline_mode<synchronous>, transform_indices = @transform_8, window_bounds = array<i64: 1, 1>}, {pipeline_mode = #tpu.pipeline_mode<synchronous>, transform_indices = @transform_9, window_bounds = array<i64: 32, 24>}, {pipeline_mode = #tpu.pipeline_mode<synchronous>, transform_indices = @transform_10, window_bounds = array<i64: 1, 24>}, {pipeline_mode = #tpu.pipeline_mode<synchronous>, transform_indices = @transform_11, window_bounds = array<i64: 24, 16>}, {pipeline_mode = #tpu.pipeline_mode<synchronous>, transform_indices = @transform_12, window_bounds = array<i64: 1, 16>}, {transform_indices = @transform_13, window_bounds = array<i64: 32, 32>}, {transform_indices = @transform_14, window_bounds = array<i64: 1, 32>}, {transform_indices = @transform_15, window_bounds = array<i64: 32, 16>}]} {
    %c0 = arith.constant 0 : index
    %c0_0 = arith.constant 0 : index
    %0 = vector.load %arg1[%c0, %c0_0] : memref<32x32xf32, #tpu.memory_space<vmem>>, vector<32x32xf32>
    %1 = arith.truncf %0 : vector<32x32xf32> to vector<32x32xbf16>
    %c0_1 = arith.constant 0 : index
    %c0_2 = arith.constant 0 : index
    %2 = vector.load %arg2[%c0_1, %c0_2] : memref<32x16xbf16, #tpu.memory_space<vmem>>, vector<32x16xbf16>
    %cst = arith.constant dense<0.000000e+00> : vector<32x16xf32>
    %3 = tpu.matmul %1, %2, %cst {dimension_numbers = #tpu.dot_dimension_numbers<[1], [0], [0], [1], [0, 0, 1, 1], [], []>} : vector<32x32xbf16>, vector<32x16xbf16>, vector<32x16xf32> -> vector<32x16xf32>
    %c0_3 = arith.constant 0 : index
    %c0_4 = arith.constant 0 : index
    %4 = vector.load %arg3[%c0_3, %c0_4] : memref<1x16xf32, #tpu.memory_space<vmem>>, vector<1x16xf32>
    %5 = vector.broadcast %4 : vector<1x16xf32> to vector<32x16xf32>
    %6 = arith.addf %3, %5 : vector<32x16xf32>
    %7 = math.tanh %6 : vector<32x16xf32>
    %8 = arith.truncf %7 : vector<32x16xf32> to vector<32x16xbf16>
    %c0_5 = arith.constant 0 : index
    %c0_6 = arith.constant 0 : index
    %9 = vector.load %arg4[%c0_5, %c0_6] : memref<16x32xbf16, #tpu.memory_space<vmem>>, vector<16x32xbf16>
    %cst_7 = arith.constant dense<0.000000e+00> : vector<32x32xf32>
    %10 = tpu.matmul %8, %9, %cst_7 {dimension_numbers = #tpu.dot_dimension_numbers<[1], [0], [0], [1], [0, 0, 1, 1], [], []>} : vector<32x16xbf16>, vector<16x32xbf16>, vector<32x32xf32> -> vector<32x32xf32>
    %c0_8 = arith.constant 0 : index
    %c0_9 = arith.constant 0 : index
    %11 = vector.load %arg5[%c0_8, %c0_9] : memref<1x32xf32, #tpu.memory_space<vmem>>, vector<1x32xf32>
    %12 = vector.broadcast %11 : vector<1x32xf32> to vector<32x32xf32>
    %13 = arith.addf %10, %12 : vector<32x32xf32>
    %14 = arith.addf %13, %0 : vector<32x32xf32>
    %c0_10 = arith.constant 0 : index
    %c0_11 = arith.constant 0 : index
    %15 = vector.load %arg14[%c0_10, %c0_11] : memref<32x32xf32, #tpu.memory_space<vmem>>, vector<32x32xf32>
    tpu.vector_store %arg14[%c0_10, %c0_11], %14 {strides = array<i32>} : memref<32x32xf32, #tpu.memory_space<vmem>>, vector<32x32xf32>,
    %16 = arith.truncf %0 : vector<32x32xf32> to vector<32x32xbf16>
    %c0_12 = arith.constant 0 : index
    %c0_13 = arith.constant 0 : index
    %17 = vector.load %arg6[%c0_12, %c0_13] : memref<32x8xbf16, #tpu.memory_space<vmem>>, vector<32x8xbf16>
    %cst_14 = arith.constant dense<0.000000e+00> : vector<32x8xf32>
    %18 = tpu.matmul %16, %17, %cst_14 {dimension_numbers = #tpu.dot_dimension_numbers<[1], [0], [0], [1], [0, 0, 1, 1], [], []>} : vector<32x32xbf16>, vector<32x8xbf16>, vector<32x8xf32> -> vector<32x8xf32>
    %c0_15 = arith.constant 0 : index
    %c0_16 = arith.constant 0 : index
    %19 = vector.load %arg7[%c0_15, %c0_16] : memref<1x8xf32, #tpu.memory_space<vmem>>, vector<1x8xf32>
    %20 = vector.broadcast %19 : vector<1x8xf32> to vector<32x8xf32>
    %21 = arith.addf %18, %20 : vector<32x8xf32>
    %22 = math.tanh %21 : vector<32x8xf32>
    %23 = arith.truncf %22 : vector<32x8xf32> to vector<32x8xbf16>
    %c0_17 = arith.constant 0 : index
    %c0_18 = arith.constant 0 : index
    %24 = vector.load %arg8[%c0_17, %c0_18] : memref<8x1xbf16, #tpu.memory_space<vmem>>, vector<8x1xbf16>
    %cst_19 = arith.constant dense<0.000000e+00> : vector<32x1xf32>
    %25 = tpu.matmul %23, %24, %cst_19 {dimension_numbers = #tpu.dot_dimension_numbers<[1], [0], [0], [1], [0, 0, 1, 1], [], []>} : vector<32x8xbf16>, vector<8x1xbf16>, vector<32x1xf32> -> vector<32x1xf32>
    %c0_20 = arith.constant 0 : index
    %c0_21 = arith.constant 0 : index
    %26 = vector.load %arg9[%c0_20, %c0_21] : memref<1x1xf32, #tpu.memory_space<vmem>>, vector<1x1xf32>
    %27 = vector.broadcast %26 : vector<1x1xf32> to vector<32x1xf32>
    %28 = arith.addf %25, %27 : vector<32x1xf32>
    %29 = tpu.transpose %28, [1, 0] : vector<32x1xf32> -> vector<1x32xf32>
    %c0_22 = arith.constant 0 : index
    %c0_23 = arith.constant 0 : index
    %30 = vector.load %arg15[%c0_22, %c0_23] : memref<1x32xf32, #tpu.memory_space<vmem>>, vector<1x32xf32>
    tpu.vector_store %arg15[%c0_22, %c0_23], %29 {strides = array<i32>} : memref<1x32xf32, #tpu.memory_space<vmem>>, vector<1x32xf32>,
    %31 = arith.truncf %0 : vector<32x32xf32> to vector<32x32xbf16>
    %c0_24 = arith.constant 0 : index
    %c0_25 = arith.constant 0 : index
    %32 = vector.load %arg10[%c0_24, %c0_25] : memref<32x24xbf16, #tpu.memory_space<vmem>>, vector<32x24xbf16>
    %cst_26 = arith.constant dense<0.000000e+00> : vector<32x24xf32>
    %33 = tpu.matmul %31, %32, %cst_26 {dimension_numbers = #tpu.dot_dimension_numbers<[1], [0], [0], [1], [0, 0, 1, 1], [], []>} : vector<32x32xbf16>, vector<32x24xbf16>, vector<32x24xf32> -> vector<32x24xf32>
    %c0_27 = arith.constant 0 : index
    %c0_28 = arith.constant 0 : index
    %34 = vector.load %arg11[%c0_27, %c0_28] : memref<1x24xf32, #tpu.memory_space<vmem>>, vector<1x24xf32>
    %35 = vector.broadcast %34 : vector<1x24xf32> to vector<32x24xf32>
    %36 = arith.addf %33, %35 : vector<32x24xf32>
    %37 = math.tanh %36 : vector<32x24xf32>
    %38 = arith.truncf %37 : vector<32x24xf32> to vector<32x24xbf16>
    %c0_29 = arith.constant 0 : index
    %c0_30 = arith.constant 0 : index
    %39 = vector.load %arg12[%c0_29, %c0_30] : memref<24x16xbf16, #tpu.memory_space<vmem>>, vector<24x16xbf16>
    %cst_31 = arith.constant dense<0.000000e+00> : vector<32x16xf32>
    %40 = tpu.matmul %38, %39, %cst_31 {dimension_numbers = #tpu.dot_dimension_numbers<[1], [0], [0], [1], [0, 0, 1, 1], [], []>} : vector<32x24xbf16>, vector<24x16xbf16>, vector<32x16xf32> -> vector<32x16xf32>
    %c0_32 = arith.constant 0 : index
    %c0_33 = arith.constant 0 : index
    %41 = vector.load %arg13[%c0_32, %c0_33] : memref<1x16xf32, #tpu.memory_space<vmem>>, vector<1x16xf32>
    %42 = vector.broadcast %41 : vector<1x16xf32> to vector<32x16xf32>
    %43 = arith.addf %40, %42 : vector<32x16xf32>
    %c0_34 = arith.constant 0 : index
    %c0_35 = arith.constant 0 : index
    %44 = vector.load %arg16[%c0_34, %c0_35] : memref<32x16xf32, #tpu.memory_space<vmem>>, vector<32x16xf32>
    tpu.vector_store %arg16[%c0_34, %c0_35], %43 {strides = array<i32>} : memref<32x16xf32, #tpu.memory_space<vmem>>, vector<32x16xf32>,
    return
  }
  func.func @transform_0(%arg0: i32) -> (i32, i32) {
    %c0_i32 = arith.constant 0 : i32
    %c0_i32_0 = arith.constant 0 : i32
    return %arg0, %c0_i32 : i32, i32
  }
  func.func @transform_1(%arg0: i32) -> (i32, i32) {
    %c0_i32 = arith.constant 0 : i32
    %c0_i32_0 = arith.constant 0 : i32
    %c0_i32_1 = arith.constant 0 : i32
    return %c0_i32, %c0_i32_0 : i32, i32
  }
  func.func @transform_2(%arg0: i32) -> (i32, i32) {
    %c0_i32 = arith.constant 0 : i32
    %c0_i32_0 = arith.constant 0 : i32
    %c0_i32_1 = arith.constant 0 : i32
    return %c0_i32, %c0_i32_0 : i32, i32
  }
  func.func @transform_3(%arg0: i32) -> (i32, i32) {
    %c0_i32 = arith.constant 0 : i32
    %c0_i32_0 = arith.constant 0 : i32
    %c0_i32_1 = arith.constant 0 : i32
    return %c0_i32, %c0_i32_0 : i32, i32
  }
  func.func @transform_4(%arg0: i32) -> (i32, i32) {
    %c0_i32 = arith.constant 0 : i32
    %c0_i32_0 = arith.constant 0 : i32
    %c0_i32_1 = arith.constant 0 : i32
    return %c0_i32, %c0_i32_0 : i32, i32
  }
  func.func @transform_5(%arg0: i32) -> (i32, i32) {
    %c0_i32 = arith.constant 0 : i32
    %c0_i32_0 = arith.constant 0 : i32
    %c0_i32_1 = arith.constant 0 : i32
    return %c0_i32, %c0_i32_0 : i32, i32
  }
  func.func @transform_6(%arg0: i32) -> (i32, i32) {
    %c0_i32 = arith.constant 0 : i32
    %c0_i32_0 = arith.constant 0 : i32
    %c0_i32_1 = arith.constant 0 : i32
    return %c0_i32, %c0_i32_0 : i32, i32
  }
  func.func @transform_7(%arg0: i32) -> (i32, i32) {
    %c0_i32 = arith.constant 0 : i32
    %c0_i32_0 = arith.constant 0 : i32
    %c0_i32_1 = arith.constant 0 : i32
    return %c0_i32, %c0_i32_0 : i32, i32
  }
  func.func @transform_8(%arg0: i32) -> (i32, i32) {
    %c0_i32 = arith.constant 0 : i32
    %c0_i32_0 = arith.constant 0 : i32
    %c0_i32_1 = arith.constant 0 : i32
    return %c0_i32, %c0_i32_0 : i32, i32
  }
  func.func @transform_9(%arg0: i32) -> (i32, i32) {
    %c0_i32 = arith.constant 0 : i32
    %c0_i32_0 = arith.constant 0 : i32
    %c0_i32_1 = arith.constant 0 : i32
    return %c0_i32, %c0_i32_0 : i32, i32
  }
  func.func @transform_10(%arg0: i32) -> (i32, i32) {
    %c0_i32 = arith.constant 0 : i32
    %c0_i32_0 = arith.constant 0 : i32
    %c0_i32_1 = arith.constant 0 : i32
    return %c0_i32, %c0_i32_0 : i32, i32
  }
  func.func @transform_11(%arg0: i32) -> (i32, i32) {
    %c0_i32 = arith.constant 0 : i32
    %c0_i32_0 = arith.constant 0 : i32
    %c0_i32_1 = arith.constant 0 : i32
    return %c0_i32, %c0_i32_0 : i32, i32
  }
  func.func @transform_12(%arg0: i32) -> (i32, i32) {
    %c0_i32 = arith.constant 0 : i32
    %c0_i32_0 = arith.constant 0 : i32
    %c0_i32_1 = arith.constant 0 : i32
    return %c0_i32, %c0_i32_0 : i32, i32
  }
  func.func @transform_13(%arg0: i32) -> (i32, i32) {
    %c0_i32 = arith.constant 0 : i32
    %c0_i32_0 = arith.constant 0 : i32
    return %arg0, %c0_i32 : i32, i32
  }
  func.func @transform_14(%arg0: i32) -> (i32, i32) {
    %c0_i32 = arith.constant 0 : i32
    %c0_i32_0 = arith.constant 0 : i32
    return %c0_i32, %arg0 : i32, i32
  }
  func.func @transform_15(%arg0: i32) -> (i32, i32) {
    %c0_i32 = arith.constant 0 : i32
    %c0_i32_0 = arith.constant 0 : i32
    return %arg0, %c0_i32 : i32, i32
  }
}

module attributes {stable_mosaic.version = 11 : i64} {
  func.func @_interact_kernel(%arg0: i32, %arg1: i32, %arg2: i32, %arg3: i32, %arg4: memref<1x16x32xbf16, #tpu.memory_space<vmem>>, %arg5: memref<1x16x32xf32, #tpu.memory_space<vmem>>, %arg6: memref<1x16x16xbf16, #tpu.memory_space<vmem>>, %arg7: memref<1x16x16xbf16, #tpu.memory_space<vmem>>, %arg8: memref<1x16x16xbf16, #tpu.memory_space<vmem>>, %arg9: memref<1x32x32xbf16, #tpu.memory_space<vmem>>, %arg10: memref<1x16x32xf32, #tpu.memory_space<vmem>>, %arg11: memref<16x16xf32, #tpu.memory_space<vmem>>, %arg12: memref<16x32xf32, #tpu.memory_space<vmem>>, %arg13: memref<16x32xf32, #tpu.memory_space<vmem>>) attributes {dimension_semantics = [#tpu.dimension_semantics<parallel>, #tpu.dimension_semantics<parallel>, #tpu.dimension_semantics<arbitrary>, #tpu.dimension_semantics<arbitrary>], iteration_bounds = array<i64: 2, 1, 2, 1>, scalar_prefetch = 0 : i64, scratch_operands = 3 : i64, tpu.core_type = #tpu.core_type<tc>, window_params = [{transform_indices = @transform_0, window_bounds = array<i64: 1, 16, 32>}, {transform_indices = @transform_1, window_bounds = array<i64: 1, 16, 32>}, {transform_indices = @transform_2, window_bounds = array<i64: 1, 16, 16>}, {transform_indices = @transform_3, window_bounds = array<i64: 1, 16, 16>}, {transform_indices = @transform_4, window_bounds = array<i64: 1, 16, 16>}, {transform_indices = @transform_5, window_bounds = array<i64: 1, 32, 32>}, {transform_indices = @transform_6, window_bounds = array<i64: 1, 16, 32>}]} {
    %c0_i32 = arith.constant 0 : i32
    %0 = arith.cmpi eq, %arg2, %c0_i32 : i32
    %c0_i32_0 = arith.constant 0 : i32
    %1 = arith.cmpi eq, %arg3, %c0_i32_0 : i32
    %2 = arith.andi %0, %1 : i1
    %3 = arith.extui %2 : i1 to i32
    %c0_i32_1 = arith.constant 0 : i32
    %4 = arith.cmpi ne, %3, %c0_i32_1 : i32
    scf.if %4 {
      %cst_21 = arith.constant 0.000000e+00 : f32
      %33 = vector.broadcast %cst_21 : f32 to vector<16x32xf32>
      %c0_22 = arith.constant 0 : index
      %c0_23 = arith.constant 0 : index
      %34 = vector.load %arg13[%c0_22, %c0_23] : memref<16x32xf32, #tpu.memory_space<vmem>>, vector<16x32xf32>
      tpu.vector_store %arg13[%c0_22, %c0_23], %33 {strides = array<i32>} : memref<16x32xf32, #tpu.memory_space<vmem>>, vector<16x32xf32>,
    } else {
    }
    %c0_i32_2 = arith.constant 0 : i32
    %5 = arith.cmpi eq, %arg3, %c0_i32_2 : i32
    %6 = arith.extui %5 : i1 to i32
    %c0_i32_3 = arith.constant 0 : i32
    %7 = arith.cmpi ne, %6, %c0_i32_3 : i32
    scf.if %7 {
      %cst_21 = arith.constant 0.000000e+00 : f32
      %33 = vector.broadcast %cst_21 : f32 to vector<16x32xf32>
      %c0_22 = arith.constant 0 : index
      %c0_23 = arith.constant 0 : index
      %34 = vector.load %arg12[%c0_22, %c0_23] : memref<16x32xf32, #tpu.memory_space<vmem>>, vector<16x32xf32>
      tpu.vector_store %arg12[%c0_22, %c0_23], %33 {strides = array<i32>} : memref<16x32xf32, #tpu.memory_space<vmem>>, vector<16x32xf32>,
      %c0_24 = arith.constant 0 : index
      %c0_25 = arith.constant 0 : index
      %c0_26 = arith.constant 0 : index
      %35 = vector.load %arg7[%c0_24, %c0_25, %c0_26] : memref<1x16x16xbf16, #tpu.memory_space<vmem>>, vector<1x16x16xbf16>
      %36 = vector.shape_cast %35 : vector<1x16x16xbf16> to vector<16x16xbf16>
      %c0_27 = arith.constant 0 : index
      %c0_28 = arith.constant 0 : index
      %c0_29 = arith.constant 0 : index
      %37 = vector.load %arg8[%c0_27, %c0_28, %c0_29] : memref<1x16x16xbf16, #tpu.memory_space<vmem>>, vector<1x16x16xbf16>
      %38 = vector.shape_cast %37 : vector<1x16x16xbf16> to vector<16x16xbf16>
      %cst_30 = arith.constant dense<0.000000e+00> : vector<16x16xf32>
      %39 = tpu.matmul %36, %38, %cst_30 {dimension_numbers = #tpu.dot_dimension_numbers<[1], [0], [0], [1], [0, 0, 1, 1], [], []>} : vector<16x16xbf16>, vector<16x16xbf16>, vector<16x16xf32> -> vector<16x16xf32>
      %c0_31 = arith.constant 0 : index
      %c0_32 = arith.constant 0 : index
      %40 = vector.load %arg11[%c0_31, %c0_32] : memref<16x16xf32, #tpu.memory_space<vmem>>, vector<16x16xf32>
      tpu.vector_store %arg11[%c0_31, %c0_32], %39 {strides = array<i32>} : memref<16x16xf32, #tpu.memory_space<vmem>>, vector<16x16xf32>,
    } else {
    }
    %c0 = arith.constant 0 : index
    %c0_4 = arith.constant 0 : index
    %8 = vector.load %arg11[%c0, %c0_4] : memref<16x16xf32, #tpu.memory_space<vmem>>, vector<16x16xf32>
    %9 = arith.truncf %8 : vector<16x16xf32> to vector<16x16xbf16>
    %c0_5 = arith.constant 0 : index
    %c0_6 = arith.constant 0 : index
    %c0_7 = arith.constant 0 : index
    %10 = vector.load %arg6[%c0_5, %c0_6, %c0_7] : memref<1x16x16xbf16, #tpu.memory_space<vmem>>, vector<1x16x16xbf16>
    %11 = vector.shape_cast %10 : vector<1x16x16xbf16> to vector<16x16xbf16>
    %cst = arith.constant dense<0.000000e+00> : vector<16x16xf32>
    %12 = tpu.matmul %9, %11, %cst {dimension_numbers = #tpu.dot_dimension_numbers<[1], [1], [0], [0], [0, 0, 1, 0], [], []>} : vector<16x16xbf16>, vector<16x16xbf16>, vector<16x16xf32> -> vector<16x16xf32>
    %13 = arith.negf %12 : vector<16x16xf32>
    %14 = math.exp %13 : vector<16x16xf32>
    %cst_8 = arith.constant 1.000000e+00 : f32
    %15 = vector.broadcast %cst_8 : f32 to vector<16x16xf32>
    %16 = arith.addf %15, %14 : vector<16x16xf32>
    %17 = arith.divf %15, %16 : vector<16x16xf32>
    %c0_9 = arith.constant 0 : index
    %c0_10 = arith.constant 0 : index
    %18 = vector.load %arg12[%c0_9, %c0_10] : memref<16x32xf32, #tpu.memory_space<vmem>>, vector<16x32xf32>
    %19 = arith.truncf %17 : vector<16x16xf32> to vector<16x16xbf16>
    %c0_11 = arith.constant 0 : index
    %c0_12 = arith.constant 0 : index
    %c0_13 = arith.constant 0 : index
    %20 = vector.load %arg4[%c0_11, %c0_12, %c0_13] : memref<1x16x32xbf16, #tpu.memory_space<vmem>>, vector<1x16x32xbf16>
    %21 = vector.shape_cast %20 : vector<1x16x32xbf16> to vector<16x32xbf16>
    %cst_14 = arith.constant dense<0.000000e+00> : vector<16x32xf32>
    %22 = tpu.matmul %19, %21, %cst_14 {dimension_numbers = #tpu.dot_dimension_numbers<[1], [0], [0], [1], [0, 0, 1, 1], [], []>} : vector<16x16xbf16>, vector<16x32xbf16>, vector<16x32xf32> -> vector<16x32xf32>
    %23 = arith.addf %18, %22 : vector<16x32xf32>
    %c0_15 = arith.constant 0 : index
    %c0_16 = arith.constant 0 : index
    %24 = vector.load %arg12[%c0_15, %c0_16] : memref<16x32xf32, #tpu.memory_space<vmem>>, vector<16x32xf32>
    tpu.vector_store %arg12[%c0_15, %c0_16], %23 {strides = array<i32>} : memref<16x32xf32, #tpu.memory_space<vmem>>, vector<16x32xf32>,
    %c0_i32_17 = arith.constant 0 : i32
    %25 = arith.cmpi eq, %arg3, %c0_i32_17 : i32
    %26 = arith.extui %25 : i1 to i32
    %c0_i32_18 = arith.constant 0 : i32
    %27 = arith.cmpi ne, %26, %c0_i32_18 : i32
    scf.if %27 {
      %c0_21 = arith.constant 0 : index
      %c0_22 = arith.constant 0 : index
      %33 = vector.load %arg13[%c0_21, %c0_22] : memref<16x32xf32, #tpu.memory_space<vmem>>, vector<16x32xf32>
      %c0_23 = arith.constant 0 : index
      %c0_24 = arith.constant 0 : index
      %34 = vector.load %arg12[%c0_23, %c0_24] : memref<16x32xf32, #tpu.memory_space<vmem>>, vector<16x32xf32>
      %35 = arith.truncf %34 : vector<16x32xf32> to vector<16x32xbf16>
      %c0_25 = arith.constant 0 : index
      %c0_26 = arith.constant 0 : index
      %c0_27 = arith.constant 0 : index
      %36 = vector.load %arg9[%c0_25, %c0_26, %c0_27] : memref<1x32x32xbf16, #tpu.memory_space<vmem>>, vector<1x32x32xbf16>
      %37 = vector.shape_cast %36 : vector<1x32x32xbf16> to vector<32x32xbf16>
      %cst_28 = arith.constant dense<0.000000e+00> : vector<16x32xf32>
      %38 = tpu.matmul %35, %37, %cst_28 {dimension_numbers = #tpu.dot_dimension_numbers<[1], [0], [0], [1], [0, 0, 1, 1], [], []>} : vector<16x32xbf16>, vector<32x32xbf16>, vector<16x32xf32> -> vector<16x32xf32>
      %39 = arith.addf %33, %38 : vector<16x32xf32>
      %c0_29 = arith.constant 0 : index
      %c0_30 = arith.constant 0 : index
      %40 = vector.load %arg13[%c0_29, %c0_30] : memref<16x32xf32, #tpu.memory_space<vmem>>, vector<16x32xf32>
      tpu.vector_store %arg13[%c0_29, %c0_30], %39 {strides = array<i32>} : memref<16x32xf32, #tpu.memory_space<vmem>>, vector<16x32xf32>,
    } else {
    }
    %c1_i32 = arith.constant 1 : i32
    %28 = arith.cmpi eq, %arg2, %c1_i32 : i32
    %c0_i32_19 = arith.constant 0 : i32
    %29 = arith.cmpi eq, %arg3, %c0_i32_19 : i32
    %30 = arith.andi %28, %29 : i1
    %31 = arith.extui %30 : i1 to i32
    %c0_i32_20 = arith.constant 0 : i32
    %32 = arith.cmpi ne, %31, %c0_i32_20 : i32
    scf.if %32 {
      %c0_21 = arith.constant 0 : index
      %c0_22 = arith.constant 0 : index
      %c0_23 = arith.constant 0 : index
      %33 = vector.load %arg5[%c0_21, %c0_22, %c0_23] : memref<1x16x32xf32, #tpu.memory_space<vmem>>, vector<1x16x32xf32>
      %34 = vector.shape_cast %33 : vector<1x16x32xf32> to vector<16x32xf32>
      %c0_24 = arith.constant 0 : index
      %c0_25 = arith.constant 0 : index
      %35 = vector.load %arg13[%c0_24, %c0_25] : memref<16x32xf32, #tpu.memory_space<vmem>>, vector<16x32xf32>
      %cst_26 = arith.constant 3.125000e-02 : f32
      %36 = vector.broadcast %cst_26 : f32 to vector<16x32xf32>
      %37 = arith.mulf %35, %36 : vector<16x32xf32>
      %38 = arith.addf %34, %37 : vector<16x32xf32>
      %c0_27 = arith.constant 0 : index
      %c0_28 = arith.constant 0 : index
      %c0_29 = arith.constant 0 : index
      %39 = vector.load %arg10[%c0_27, %c0_28, %c0_29] : memref<1x16x32xf32, #tpu.memory_space<vmem>>, vector<1x16x32xf32>
      %40 = vector.shape_cast %39 : vector<1x16x32xf32> to vector<16x32xf32>
      %41 = vector.shape_cast %38 : vector<16x32xf32> to vector<1x16x32xf32>
      tpu.vector_store %arg10[%c0_27, %c0_28, %c0_29], %41 {strides = array<i32>} : memref<1x16x32xf32, #tpu.memory_space<vmem>>, vector<1x16x32xf32>,
    } else {
    }
    return
  }
  func.func @transform_0(%arg0: i32, %arg1: i32, %arg2: i32, %arg3: i32) -> (i32, i32, i32) {
    %c0_i32 = arith.constant 0 : i32
    %c0_i32_0 = arith.constant 0 : i32
    return %arg0, %arg3, %c0_i32 : i32, i32, i32
  }
  func.func @transform_1(%arg0: i32, %arg1: i32, %arg2: i32, %arg3: i32) -> (i32, i32, i32) {
    %c0_i32 = arith.constant 0 : i32
    %c0_i32_0 = arith.constant 0 : i32
    return %arg0, %arg1, %c0_i32 : i32, i32, i32
  }
  func.func @transform_2(%arg0: i32, %arg1: i32, %arg2: i32, %arg3: i32) -> (i32, i32, i32) {
    %c0_i32 = arith.constant 0 : i32
    %c0_i32_0 = arith.constant 0 : i32
    return %arg0, %arg3, %c0_i32 : i32, i32, i32
  }
  func.func @transform_3(%arg0: i32, %arg1: i32, %arg2: i32, %arg3: i32) -> (i32, i32, i32) {
    %c0_i32 = arith.constant 0 : i32
    %c0_i32_0 = arith.constant 0 : i32
    return %arg0, %arg1, %c0_i32 : i32, i32, i32
  }
  func.func @transform_4(%arg0: i32, %arg1: i32, %arg2: i32, %arg3: i32) -> (i32, i32, i32) {
    %c0_i32 = arith.constant 0 : i32
    %c0_i32_0 = arith.constant 0 : i32
    %c0_i32_1 = arith.constant 0 : i32
    return %arg2, %c0_i32, %c0_i32_0 : i32, i32, i32
  }
  func.func @transform_5(%arg0: i32, %arg1: i32, %arg2: i32, %arg3: i32) -> (i32, i32, i32) {
    %c0_i32 = arith.constant 0 : i32
    %c0_i32_0 = arith.constant 0 : i32
    %c0_i32_1 = arith.constant 0 : i32
    return %arg2, %c0_i32, %c0_i32_0 : i32, i32, i32
  }
  func.func @transform_6(%arg0: i32, %arg1: i32, %arg2: i32, %arg3: i32) -> (i32, i32, i32) {
    %c0_i32 = arith.constant 0 : i32
    %c0_i32_0 = arith.constant 0 : i32
    return %arg0, %arg1, %c0_i32 : i32, i32, i32
  }
}

</mosaic_0001>

<bundles_post_ra>
// kernel: model_forward.5
= control target key start
LH: loop header
LB: loop body
LE: loop exit
PB: predicated region body
PF: predicated region fallthrough
CT: control target
= control target key end

     0   :  { %11 = vsyncpa [#allocation6], 0  ;;  %s1430_s0 = inlined_call_operand.vmem [shape: bf16[2,16,32], index: 0, kind: input, shape index: {}]   ;;  %s1431_s1 = inlined_call_operand.vmem [shape: f32[2,16,32], index: 1, kind: input, shape index: {}]   ;;  %s1432_s2 = inlined_call_operand.vmem [shape: bf16[2,16,16], index: 2, kind: input, shape index: {}, may-alias: {2,3}]   ;;  %s1433_s3 = inlined_call_operand.vmem [shape: bf16[2,16,16], index: 3, kind: input, shape index: {}, may-alias: {2,3}]   ;;  %s1434_s4 = inlined_call_operand.vmem [shape: bf16[2,16,16], index: 4, kind: input, shape index: {}]   ;;  %s1435_s5 = inlined_call_operand.vmem [shape: bf16[2,32,32], index: 5, kind: input, shape index: {}]   ;;  %s1436_s6 = inlined_call_operand.hbm [shape: f32[2,16,32], index: 6, kind: output, shape index: {}]  }
   0x1   :  { %13 = vsyncpa [#allocation6 + $0x1], 0  ;;  %s1228_s21 = smov 0   ;;  %s1230_s22 = smov 0  }
   0x2   :  { %s1232_s23 = smov 0   ;;  %s1234_s24 = smov 0  }
   0x3   :  { %s1236_s25 = smov 0   ;;  %s1238_s26 = smov 0  }
   0x4   :  { %s1240_s27 = smov 0   ;;  %s1242_s28 = smov 0  }
   0x5 LB: > { %1446 = sst [smem:[#allocation8_spill]] %s1157_s21  ;;  %s920_s29 = sadd.s32 4294967295, %s1185_s28   ;;  %s1185_s28 = sphi %s1242_s28, %s19_s28   ;;  %s1181_s27 = sphi %s1240_s27, %s1467_s27   ;;  %s1177_s26 = sphi %s1238_s26, %s1466_s26   ;;  %s1173_s25 = sphi %s1236_s25, %s1465_s25   ;;  %s1169_s24 = sphi %s1234_s24, %s1464_s24   ;;  %s1165_s23 = sphi %s1232_s23, %s1463_s23   ;;  %s1161_s22 = sphi %s1230_s22, %s1469_s22   ;;  %s1157_s21 = sphi %s1228_s21, %s1468_s21  }
   0x6   : > { %1447 = sst [smem:[#allocation9_spill]] %s1165_s23  ;;  %s921_s30 = sadd.s32 4294967294, %s1185_s28  }
   0x7   : > { %1448 = sst [smem:[#allocation10_spill]] %s1177_s26  ;;  %s37_s7 = sadd.s32 1, %s1177_s26 }
   0x8   : > { %1449 = sst [smem:[#allocation11_spill]] %s1181_s27  ;;  %p39_p0 = scmp.ge.s32.totalorder %s37_s7, 2 }
   0x9   : > { %1450 = sst [smem:[#allocation12_spill]] %s1185_s28  ;;  %s45_s8 = sadd.s32 1, %s1181_s27 }
   0xa   : > { %p228_p1 = scmp.ne.s32.totalorder %s1165_s23, %s1161_s22  ;;  %p229_p2 = scmp.eq.s32.totalorder %s920_s29, 3 }
   0xb   : > { %s1471_s7 = smov (%p39_p0, %s37_s7), 0  ;;  %s1473_s8 = smov (!%p39_p0, %s45_s8), %s1181_s27 }
   0xc   : > { %1451 = sst [smem:[#allocation13_spill]] %s1471_s7  ;;  %p1277_p3 = por %p229_p2, %p228_p1 }
   0xd   : > { %p234_p4 = scmp.ne.s32.totalorder %s1161_s22, %s1157_s21  ;;  %p47_p5 = scmp.ge.s32.totalorder %s1473_s8, 2 }
   0xe   : > { %p235_p6 = scmp.eq.s32.totalorder %s921_s30, 3  ;;  %p924_p7 = scmp.ge.s32.totalorder %s1185_s28, 1 }
   0xf   : > { %p321_p8 = scmp.lt.s32.totalorder %s1185_s28, 5  ;;  %s1475_s8 = smov (%p47_p5, %s1473_s8), 0 }
  0x10   : > { %1453 = sst [smem:[#allocation14_spill]] %s1475_s8  ;;  %p1287_p9 = por %p235_p6, %p234_p4 }
  0x11   : > { %p322_p10 = pnand %p924_p7, %p321_p8  ;;  %s213_s11 = ssub.s32 %s1181_s27, %s1475_s8 }
  0x12   : > { %s1454_s10 = scalar_select %p1287_p9, 1, 0 }
  0x13   : > { %s218_s12 = sadd.s32 1, %s1165_s23  ;;  %p216_p11 = scmp.eq.s32.totalorder %s213_s11, 0 }
  0x14   : > { %1455 = sst [smem:[#allocation15_spill]] %s1454_s10  ;;  %325 = sbr.rel (%p322_p10) target bundleno = 993 (0x3e1), region = 44 }
  0x15   : > { %s1295_s13 = scalar_select %p216_p11, %s1165_s23, %s218_s12  }
  0x16   : > { %s1438_s14 = sand.u32 (!%p322_p10), 1, %s1161_s22   ;;  %p393_p12 = scmp.lt.s32.totalorder (!%p322_p10), %s1173_s25, 1 }
  0x17   : > { %1456 = sst [smem:[#allocation16_spill]] %s1295_s13  ;;  %s925_s15 = sshll.u32 (!%p322_p10), %s1438_s14, 4 }
  0x18   : > { %p432_p13 = scmp.lt.s32.totalorder (!%p322_p10), %s1169_s24, 1  ;;  %p444_p0 = scmp.eq.s32.totalorder (!%p322_p10), %s1169_s24, 0 }
  0x1b   : > { %s394_s16 = scalar_select %p393_p12, %s1173_s25, 1 }
  0x1c   : > { %s433_s17 = scalar_select %p432_p13, %s1169_s24, 1 }
  0x1d   : > { %s1305_s18 = sshll.u32 %s394_s16, 3  ;;  %s958_s19 = sshll.u32 %s394_s16, 4  ;;  %vm450_vm0 = vcmask (%p444_p0), 261120   ;;  %v1187_v0 = vmov (%p444_p0), 0.0  }
  0x1e   : > { %s1314_s8 = scalar_lea.vmem %s1431_s1, %s958_s19  ;;  %s420_s27 = scalar_lea.vmem %s1432_s2, %s1305_s18  ;;  %451 = vst.msk [vmem:[#allocation4] sm:$0xff] (%p444_p0), %vm450_vm0, %v1187_v0  ;;  %452 = vst.msk [vmem:[#allocation4 + $0x8] sm:$0xff] (%p444_p0), %vm450_vm0, %v1187_v0 }
  0x1f   : > { %s430_s23 = scalar_lea.vmem %s1433_s3, %s1305_s18  ;;  %s961_s10 = sshll.u32 %s433_s17, 3 }
  0x20   : > { %s962_s21 = sshll.u32 %s433_s17, 4  ;;  %s436_s20 = scalar_lea.vmem %s1434_s4, %s961_s10 }
  0x21   : > { %s1330_s11 = scalar_lea.vmem %s1435_s5, %s962_s21  ;;  %s1332_s19 = scalar_lea.vmem [#allocation5], %s925_s15 }
  0x22   : > { %449 = sbr.rel (!%p444_p0) target bundleno = 41 (0x29), region = 48 }
  0x29 PF: > { %v1077_v1 = vld [vmem:[%s436_s20] sm:$0xff]   ;;  %v1188_v2 = vmov 0.0   ;;  %vm1189_vm1 = vmmov 0   ;;  %vm474_vm2 = vcmask 130048   ;;  %s1457_s26 = scalar_lea.vmem %s1430_s0, %s1305_s18  ;;  %vm456_vm3 = vcmask 261120   ;;  %v1082_v28 = vld [vmem:[%s1330_s11 + $0x8] sm:$0xff]  }
  0x2a   : > { %975 = vmatprep.subr.bf16.mxu0 %v1188_v2  ;;  %v1078_v3 = vld [vmem:[%s430_s23] sm:$0xff]   ;;  %981 = vmatprep.subr.bf16.mxu1 %v1188_v2  ;;  %457 = vst.msk [vmem:[#allocation3] sm:$0xff] %vm456_vm3, %v1188_v2  ;;  %458 = vst.msk [vmem:[#allocation3 + $0x8] sm:$0xff] %vm456_vm3, %v1188_v2  ;;  %p723_p1 = scmp.eq.s32.totalorder %s1169_s24, 1  ;;  %v655_v42 = vld [vmem:[#allocation4 + $0x8] sm:$0xff] }
  0x2b   : > { %976 = vmatpush3.bf16.msra.mxu0 %v1077_v1  ;;  %977 = vmatprep.mubr.msk.bf16.mxu0 %vm1189_vm1, %v1188_v2  ;;  %v1079_v4 = vld [vmem:[%s420_s27] sm:$0xff]   ;;  %v729_v51 = vld [vmem:[%s1314_s8 + $0x8] sm:$0xff] (%p723_p1) }
  0x2c   : > { %983 = vmatprep.mubr.msk.bf16.mxu1 %vm1189_vm1, %v1188_v2  ;;  %987 = vmatprep.subr.bf16.mxu0 %v1188_v2  ;;  %v536_v5 = vsel %vm474_vm2, %v1079_v4, 0  ;;  %v1080_v13 = vld [vmem:[%s1457_s26] sm:$0xff]  }
  0x2d   : > { %982 = vmatpush3.bf16.xpose.msra.mxu1 %v536_v5  ;;  %v1081_v27 = vld [vmem:[%s1330_s11] sm:$0xff]  }
  0x2e   : > { %978 = vmatmul.mubr.msk.bf16.vlgmr.msra.gmra.mrb[0].mxu0 %vm474_vm2, %v1078_v3  ;;  %993 = vmatprep.subr.bf16.mxu1 %v1188_v2  ;;  %v654_v40 = vld [vmem:[#allocation4] sm:$0xff] }
  0x2f   : > { %989 = vmatprep.mubr.msk.bf16.mxu0 %vm1189_vm1, %v1188_v2  ;;  %988 = vmatpush3.bf16.msra.mxu0 %v1080_v13  ;;  %v728_v48 = vld [vmem:[%s1314_s8] sm:$0xff] (%p723_p1) }
  0x31   : > { %v591_v29 = vld [vmem:[#allocation3] sm:$0xff]  ;;  %v592_v31 = vld [vmem:[#allocation3 + $0x8] sm:$0xff] }
 0x101   : > { %v512_v6 = vpop.f32.mrb[0].mxu0 }
 0x102   : > { %519 = vst.msk [vmem:[#allocation2] sm:$0xff] %vm474_vm2, %v512_v6  ;;  %v979_v7 = vpop.f32.mrb[1].mxu0 }
 0x103   : > { %v515_v8 = vpop.f32.mrb[2].mxu0 }
 0x104   : > { %520 = vst.msk [vmem:[#allocation2 + $0x8] sm:$0xff] %vm474_vm2, %v515_v8  ;;  %v980_v9 = vpop.f32.mrb[3].mxu0 }
 0x109   : > { %v521_v10 = vld [vmem:[#allocation2] sm:$0xff] }
 0x10b   : > { %v522_v11 = vld [vmem:[#allocation2 + $0x8] sm:$0xff] }
 0x10c   : > { %v523_v12 = vpack.c.bf16 %v522_v11, %v521_v10 }
 0x10e   : > { %984 = vmatmul.mubr.msk.bf16.vlgmr.msra.gmra.mrb[0].mxu1 %vm474_vm2, %v523_v12 }
 0x10f   : > { %997 = vmatprep.mubr.msk.bf16.mxu1 %vm1189_vm1, %v1188_v2  ;;  %994 = vmatpush3.bf16.msra.mxu1 %v1081_v27 }
 0x110   : > { %995 = vmatprep.subr.bf16.mxu1 %v1188_v2 }
 0x113   : > { %996 = vmatpush3.bf16.msra.mxu1 %v1082_v28 }
 0x1e1   : > { %v572_v14 = vpop.f32.mrb[0].mxu1 }
 0x1e2   : > { %v944_v15 = vmul.f32 -1.442695, %v572_v14  ;;  %v985_v16 = vpop.f32.mrb[1].mxu1 }
 0x1e3   : > { %v575_v17 = vpop.f32.mrb[2].mxu1 }
 0x1e4   : > { %1083 = vpow2.f32 %v944_v15  ;;  %v945_v18 = vmul.f32 -1.442695, %v575_v17  ;;  %v986_v19 = vpop.f32.mrb[3].mxu1 }
 0x1e6   : > { %1085 = vpow2.f32 %v945_v18 }
 0x1ee   : > { %v1084_v20 = vpop.eup %1083 }
 0x1ef   : > { %v585_v21 = vadd.f32 1.0, %v1084_v20 }
 0x1f0   : > { %v1086_v22 = vpop.eup %1085 }
 0x1f1   : > { %v586_v23 = vadd.f32 1.0, %v1086_v22  ;;  %1087 = vrcp.f32 %v585_v21 }
 0x1f3   : > { %1089 = vrcp.f32 %v586_v23 }
 0x1fb   : > { %v1088_v24 = vpop.eup %1087 }
 0x1fd   : > { %v1090_v25 = vpop.eup %1089 }
 0x1fe   : > { %v593_v26 = vpack.c.bf16 %v1090_v25, %v1088_v24 }
 0x200   : > { %990 = vmatmul.mubr.msk.bf16.vlgmr.msra.gmra.mrb[4].mxu0 %vm474_vm2, %v593_v26 }
 0x2d3   : > { %v639_v30 = vpop.f32.mrb[4].mxu0 }
 0x2d4   : > { %v646_v32 = vadd.f32 %v639_v30, %v591_v29  ;;  %v991_v33 = vpop.f32.mrb[5].mxu0 }
 0x2d5   : > { %v642_v34 = vpop.f32.mrb[6].mxu0 }
 0x2d6   : > { %649 = vst.msk [vmem:[#allocation3] sm:$0xff] %vm456_vm3, %v646_v32  ;;  %v647_v35 = vadd.f32 %v642_v34, %v592_v31  ;;  %v992_v36 = vpop.f32.mrb[7].mxu0 }
 0x2d8   : > { %650 = vst.msk [vmem:[#allocation3 + $0x8] sm:$0xff] %vm456_vm3, %v647_v35 }
 0x2dd   : > { %v656_v37 = vld [vmem:[#allocation3] sm:$0xff] }
 0x2df   : > { %v657_v38 = vld [vmem:[#allocation3 + $0x8] sm:$0xff] }
 0x2e0   : > { %v658_v39 = vpack.c.bf16 %v657_v38, %v656_v37 }
 0x2e2   : > { %998 = vmatmul.mubr.msk.bf16.vlgmr.msra.gmra.mrb[4].mxu1 %vm456_vm3, %v658_v39 }
 0x3b4   : > { %727 = sbr.rel (!%p723_p1) target bundleno = 967 (0x3c7), region = 60 }
 0x3b5   : > { %v712_v41 = vpop.f32.mrb[4].mxu1 }
 0x3b6   : > { %v719_v43 = vadd.f32 %v712_v41, %v654_v40  ;;  %v999_v44 = vpop.f32.mrb[5].mxu1 }
 0x3b7   : > { %v715_v45 = vpop.f32.mrb[6].mxu1 }
 0x3b8   : > { %721 = vst.msk [vmem:[#allocation4] sm:$0xff] %vm456_vm3, %v719_v43  ;;  %v720_v46 = vadd.f32 %v715_v45, %v655_v42  ;;  %v1000_v47 = vpop.f32.mrb[7].mxu1 }
 0x3ba   : > { %722 = vst.msk [vmem:[#allocation4 + $0x8] sm:$0xff] %vm456_vm3, %v720_v46 }
 0x3bf   : > { %v730_v49 = vld [vmem:[#allocation4] sm:$0xff] }
 0x3c0   : > { %v732_v50 = vmul.f32 0.03125, %v730_v49 }
 0x3c1   : > { %v731_v52 = vld [vmem:[#allocation4 + $0x8] sm:$0xff] }
 0x3c2   : > { %v733_v53 = vmul.f32 0.03125, %v731_v52  ;;  %v734_v54 = vadd.f32 %v732_v50, %v728_v48 }
 0x3c4   : > { %v735_v55 = vadd.f32 %v733_v53, %v729_v51  ;;  %736 = vst.msk [vmem:[%s1332_s19] sm:$0xff] %vm456_vm3, %v734_v54 }
 0x3c6   : > { %737 = vst.msk [vmem:[%s1332_s19 + $0x8] sm:$0xff] %vm456_vm3, %v735_v55 }
 0x3c7 PF: > { %s965_s24 = sshll.u32 %s1173_s25, 8  ;;  %s754_s8 = sshll.u32 %s1332_s19, 4  ;;  %s1374_s8 = int_to_ptr.vmem [resolvable:$true] %s754_s8 }
 0x3c8   : > { %s1371_s7 = scalar_lea.hbm %s1436_s6, %s965_s24  ;;  %s1458_s10 = sand.u32 1, %s1161_s22  }
 0x3c9   : > { %s1378_s13 = scalar_lea.sflag [#allocation6], %s1458_s10  ;;  %s1091_s14 = scalar_lea.vmem %s1374_s8, 256 }
 0x3ca   : > { %p1092_p2 = scmp.ne.s32.totalorder %s1374_s8, %s1091_s14  ;;  %s1190_s25 = smov [#allocation5]  }
 0x3cb   : > { %s1095_s15 = sshll.u32 %s1190_s25, 4  ;;  %s1096_s15 = int_to_ptr.vmem [resolvable:$false] %s1095_s15 }
 0x3cc   : > { %p1093_p4 = pnand %p1092_p2, %p1277_p3  ;;  %s1097_s17 = scalar_lea.vmem %s1096_s15, 512 }
 0x3cd   : > { %p1098_p6 = scmp.lt.s32.totalorder %s1374_s8, %s1096_s15  ;;  %p1099_p7 = scmp.lt.s32.totalorder %s1097_s17, %s1091_s14 }
 0x3ce   : > { %p1094_p5 = pneg %p1093_p4 }
 0x3cf   : > { %p1100_p8 = por %p1099_p7, %p1098_p6 }
 0x3d1   : > { %p1101_p10 = pnand %p1100_p8, %p1094_p5 }
 0x3d3   : > { %1104 = shalt.err (!%p1101_p10)
}
 0x3d4   : > { %s1105_s18 = scalar_lea.hbm %s1371_s7, 256  ;;  %s1109_s16 = scalar_lea.hbm %s1436_s6, 512 }
 0x3d5   : > { %p1106_p11 = scmp.ne.s32.totalorder %s1371_s7, %s1105_s18  ;;  %p1110_p0 = scmp.lt.u32.totalorder %s1371_s7, %s1436_s6 }
 0x3d6   : > { %p1111_p1 = scmp.lt.u32.totalorder %s1109_s16, %s1105_s18  ;;  %p1113_p4 = scmp.lt.u32.totalorder %s1105_s18, %s1371_s7 }
 0x3d7   : > { %p1107_p12 = pnand %p1106_p11, %p1277_p3 }
 0x3d8   : > { %p1112_p2 = por %p1111_p1, %p1110_p0 }
 0x3d9   : > { %p1108_p13 = pneg %p1107_p12 }
 0x3da   : > { %p1114_p5 = por %p1113_p4, %p1112_p2 }
 0x3dc   : > { %p1115_p6 = pnand %p1114_p5, %p1108_p13 }
 0x3de   : > { %1118 = shalt.err (!%p1115_p6)
}
 0x3df   : > { %s1191_s11 = smov 128   ;;  %s1192_s19 = smov 8  }
 0x3e0   : > { %1001 = dma.vmem_to_hbm [thread:$0]  (%p1277_p3), %s1374_s8, 256, %s1371_s7, %s1378_s13, %s1191_s11, %s1191_s11, %s1192_s19  }
 0x3e1 PF: > { %s1459_s21 = sld [smem:[#allocation12_spill]]  ;;  %s1460_s23 = sld [smem:[#allocation8_spill]] }
 0x3e7   : > { %p1007_p7 = scmp.ge.s32.totalorder %s1459_s21, 2  ;;  %s769_s24 = sand.u32 1, %s1460_s23  }
 0x3e8   : > { %s770_s27 = scalar_lea.sflag [#allocation6], %s769_s24 }
 0x3e9   : > { %p1004_p8 = pnand %p1007_p7, %p1287_p9 }
 0x3eb   : > { %1152 = dma.done.wait (!%p1004_p8), %s770_s27, 256  }
 0x3ec   : > { %1154 = vsyncadd (!%p1004_p8), %s770_s27, 4294967040  ;;  %s19_s28 = sadd.s32 1, %s1459_s21   ;;  %s1462_s10 = sld [smem:[#allocation9_spill]] }
 0x3ed   : > { %p16_p10 = scmp.ge.s32.totalorder %s19_s28, 6   ;;  %s1463_s23 = sld [smem:[#allocation16_spill]] }
 0x3ee   : > { %s1464_s24 = sld [smem:[#allocation10_spill]]  ;;  %s1465_s25 = sld [smem:[#allocation11_spill]] }
 0x3ef   : > { %s1466_s26 = sld [smem:[#allocation13_spill]]  ;;  %s1467_s27 = sld [smem:[#allocation14_spill]] }
 0x3f0   : > { %s1468_s21 = smov %s1161_s22  ;;  %18 = sbr.rel (!%p16_p10) target bundleno = 5 (0x5), region = 110 }
 0x3f2   : > { %s1469_s22 = smov %s1462_s10 }
 0x3f7   :  { %775 = vsyncpa [#allocation6], 1 }
 0x3f8   :  { %777 = vsyncpa [#allocation6 + $0x1], 1 }

// kernel: model_forward.4
= control target key start
LH: loop header
LB: loop body
LE: loop exit
PB: predicated region body
PF: predicated region fallthrough
CT: control target
= control target key end

     0   :  { %s1468_s15 = smov 0   ;;  %s1470_s16 = smov 0   ;;  %s1547_s0 = inlined_call_operand.vmem [shape: f32[2,16,16], index: 0, kind: input, shape index: {}, may-alias: {0,1}]   ;;  %s1548_s1 = inlined_call_operand.vmem [shape: f32[2,16,16], index: 1, kind: input, shape index: {}, may-alias: {0,1}]   ;;  %s1549_s2 = inlined_call_operand.vmem [shape: f32[2,1,16], index: 2, kind: input, shape index: {}]   ;;  %s1550_s3 = inlined_call_operand.vmem [shape: bf16[2,16,32], index: 3, kind: input, shape index: {}]   ;;  %s1551_s4 = inlined_call_operand.vmem [shape: f32[2,16,32], index: 4, kind: output, shape index: {}]  }
   0x1   :  { %s1472_s17 = smov 0  }
   0x2 LB: > { %s33_s18 = sadd.s32 1, %s1433_s16  ;;  %p1242_p0 = scmp.ge.s32.totalorder %s1437_s17, 1  ;;  %s1437_s17 = sphi %s1472_s17, %s14_s17   ;;  %s1433_s16 = sphi %s1470_s16, %s1553_s16   ;;  %s1429_s15 = sphi %s1468_s15, %s1552_s15  }
   0x3   : > { %p35_p1 = scmp.ge.s32.totalorder %s33_s18, 2  ;;  %p237_p2 = scmp.lt.s32.totalorder %s1437_s17, 3 }
   0x5   : > { %s1555_s18 = smov (%p35_p1, %s33_s18), 0  ;;  %p238_p3 = pnand %p1242_p0, %p237_p2 }
   0x6   : > { %p296_p4 = scmp.lt.s32.totalorder (!%p238_p3), %s1429_s15, 1  ;;  %vm361_vm0 = vcmask (!%p238_p3), 130048   ;;  %vm346_vm1 = vcmask (!%p238_p3), 7168   ;;  %v1439_v42 = vmov (!%p238_p3), -inf   ;;  %v922_v49 = vlaneseq (!%p238_p3) }
   0x7   : > { %241 = sbr.rel (%p238_p3) target bundleno = 905 (0x389), region = 36  ;;  %347 = vst.msk [vmem:[#allocation2] sm:$0xff] (!%p238_p3), %vm346_vm1, %v1439_v42  ;;  %348 = vst.msk [vmem:[#allocation2 + $0x8] sm:$0xff] (!%p238_p3), %vm346_vm1, %v1439_v42  ;;  %vm351_vm6 = vcmask (!%p238_p3), 261120   ;;  %vm1442_vm7 = vmmov (!%p238_p3), 0  }
   0x8   : > { %v923_v50 = vshrl.u32 (!%p238_p3), %v922_v49, 7 }
   0xa   : > { %v924_v52 = vsub.s32 (!%p238_p3), 0, %v923_v50 }
   0xe   : > { %s1557_s15 = smov (!%p296_p4, %s1429_s15), 1 }
   0xf   : > { %s1489_s19 = sshll.u32 %s1557_s15, 4  ;;  %s320_s28 = scalar_lea.vmem %s1549_s2, %s1557_s15 }
  0x10   : > { %s313_s22 = scalar_lea.vmem %s1548_s1, %s1489_s19  ;;  %s303_s25 = scalar_lea.vmem %s1547_s0, %s1489_s19 }
  0x11   : > { %v356_v0 = vld [vmem:[%s313_s22] sm:$0xff]  ;;  %v357_v1 = vld [vmem:[%s313_s22 + $0x8] sm:$0xff]  ;;  %s1258_s29 = sshll.u32 %s1557_s15, 3  ;;  %s339_s9 = scalar_lea.vmem %s1551_s4, %s1489_s19 }
  0x12   : > { %v354_v2 = vld [vmem:[%s303_s25] sm:$0xff]  ;;  %v368_v3 = vmul.f32 %v356_v0, %v356_v0  ;;  %v383_v4 = vsel %vm361_vm0, %v356_v0, 0  ;;  %v386_v5 = vsel %vm361_vm0, %v357_v1, 0  ;;  %v369_v6 = vmul.f32 %v357_v1, %v357_v1  ;;  %v355_v7 = vld [vmem:[%s303_s25 + $0x8] sm:$0xff]  ;;  %s329_s6 = scalar_lea.vmem %s1550_s3, %s1258_s29 }
  0x13   : > { %v389_v8 = vand.u32 4294901760, %v383_v4  ;;  %v392_v9 = vand.u32 4294901760, %v386_v5  ;;  %v377_v10 = vsel %vm361_vm0, %v354_v2, 0  ;;  %v380_v11 = vsel %vm361_vm0, %v355_v7, 0 }
  0x14   : > { %v370_v12 = vsel %vm361_vm0, %v368_v3, 0.0  ;;  %v455_v13 = vand.u32 4294901760, %v377_v10  ;;  %v465_v14 = vand.u32 4294901760, %v380_v11  ;;  %v359_v18 = vmul.f32 %v354_v2, %v354_v2 }
  0x15   : > { %v1334_v15 = vpack.c.bf16 %v392_v9, %v389_v8  ;;  %v477_v16 = vsub.f32 %v383_v4, %v389_v8  ;;  %371 = vadd.xlane.f32.xlu0 %v370_v12  ;;  %v484_v17 = vsub.f32 %v386_v5, %v392_v9  ;;  %v373_v19 = vsel %vm361_vm0, %v369_v6, 0.0  ;;  %v1251_v4 = vld [vmem:[%s320_s28] ss:$0 sm:$0xff] }
  0x16   : > { %v456_v20 = vsub.f32 %v377_v10, %v455_v13  ;;  %v466_v21 = vsub.f32 %v380_v11, %v465_v14  ;;  %v360_v22 = vmul.f32 %v355_v7, %v355_v7  ;;  %v362_v26 = vsel %vm361_vm0, %v359_v18, 0.0 }
  0x17   : > { %v1342_v23 = vpack.c.bf16 %v484_v17, %v477_v16  ;;  %1335 = vmatprep.subr.bf16.mxu1 %v1334_v15  ;;  %v478_v24 = vand.u32 4294901760, %v477_v16  ;;  %v485_v25 = vand.u32 4294901760, %v484_v17  ;;  %363 = vadd.xlane.f32.xlu1 %v362_v26 }
  0x18   : > { %1304 = vmatprep.mubr.f32.mxu0 %v456_v20  ;;  %v457_v27 = vand.u32 4294901760, %v456_v20  ;;  %v467_v28 = vand.u32 4294901760, %v466_v21  ;;  %1337 = vmatpush3.bf16.xpose.msra.mxu1 %v1334_v15  ;;  %v365_v35 = vsel %vm361_vm0, %v360_v22, 0.0 }
  0x19   : > { %1343 = vmatprep.subr.bf16.mxu0 %v1342_v23  ;;  %374 = vadd.xlane.f32.xlu0 %v373_v19  ;;  %v479_v29 = vsub.f32 %v477_v16, %v478_v24  ;;  %v486_v30 = vsub.f32 %v484_v17, %v485_v25  ;;  %v1350_v39 = vpack.c.bf16 %v485_v25, %v478_v24  ;;  %v1441_v16 = vmov 0.0   ;;  %v956_v17 = vld [vmem:[#allocation2] sm:$0xff] }
  0x1a   : > { %1345 = vmatpush3.bf16.xpose.msra.mxu0 %v1342_v23  ;;  %v458_v31 = vsub.f32 %v456_v20, %v457_v27  ;;  %v468_v32 = vsub.f32 %v466_v21, %v467_v28  ;;  %349 = vst.msk [vmem:[#allocation3] sm:$0xff] %vm346_vm1, %v1441_v16  ;;  %350 = vst.msk [vmem:[#allocation3 + $0x8] sm:$0xff] %vm346_vm1, %v1441_v16  ;;  %v957_v20 = vld [vmem:[#allocation2 + $0x8] sm:$0xff]  ;;  %v1398_v25 = vld [vmem:[%s329_s6] sm:$0xff]  }
  0x1b   : > { %1347 = vmatprep.subr.bf16.mxu0 %v1334_v15  ;;  %v480_v33 = vand.u32 4294901760, %v479_v29  ;;  %v487_v34 = vand.u32 4294901760, %v486_v30  ;;  %366 = vadd.xlane.f32.xlu1 %v365_v35  ;;  %352 = vst.msk [vmem:[#allocation4] sm:$0xff] %vm351_vm6, %v1441_v16  ;;  %353 = vst.msk [vmem:[#allocation4 + $0x8] sm:$0xff] %vm351_vm6, %v1441_v16 }
  0x1c   : > { %v459_v36 = vand.u32 4294901760, %v458_v31  ;;  %v469_v37 = vand.u32 4294901760, %v468_v32 }
  0x1d   : > { %v1338_v38 = vpack.c.bf16 %v487_v34, %v480_v33 }
  0x1e   : > { %1290 = vmatprep.mubr.f32.mxu1 %v459_v36 }
  0x1f   : > { %1291 = vmatmul.mubr.f32.vlgmr.msra.gmra.mrb[0].mxu1 %v469_v37  ;;  %1339 = vmatprep.subr.bf16.mxu1 %v1338_v38 }
  0x20   : > { %1341 = vmatpush3.bf16.xpose.msra.mxu1 %v1338_v38  ;;  %1297 = vmatprep.mubr.f32.mxu1 %v455_v13 }
  0x21   : > { %1305 = vmatmul.mubr.f32.vlgmr.msra.gmra.mrb[0].mxu0 %v466_v21  ;;  %1328 = vmatprep.subr.bf16.mxu1 %v1441_v16 }
  0x22   : > { %1349 = vmatpush3.bf16.xpose.msra.mxu0 %v1334_v15  ;;  %1311 = vmatprep.mubr.f32.mxu0 %v457_v27 }
  0x23   : > { %1351 = vmatprep.subr.bf16.mxu0 %v1350_v39 }
  0x27   : > { %1298 = vmatmul.mubr.f32.vlgmr.msra.gmra.mrb[0].mxu1 %v465_v14 }
  0x28   : > { %1329 = vmatpush3.bf16.msra.mxu1 %v1398_v25  ;;  %1330 = vmatprep.mubr.msk.bf16.mxu1 %vm1442_vm7, %v1441_v16 }
  0x29   : > { %1312 = vmatmul.mubr.f32.vlgmr.msra.gmra.mrb[0].mxu0 %v467_v28 }
  0x2a   : > { %1353 = vmatpush3.bf16.xpose.msra.mxu0 %v1350_v39  ;;  %1318 = vmatprep.mubr.f32.mxu0 %v455_v13 }
  0x2b   : > { %1355 = vmatprep.subr.bf16.mxu0 %v1334_v15 }
  0x31   : > { %1319 = vmatmul.mubr.f32.vlgmr.msra.gmra.mrb[0].mxu0 %v465_v14 }
  0x32   : > { %1357 = vmatpush3.bf16.xpose.msra.mxu0 %v1334_v15  ;;  %1325 = vmatprep.mubr.f32.mxu0 %v455_v13  ;;  %v1440_v15 = vmov 0  }
  0x33   : > { %1396 = vset.pattern.permute.xlu1 %v1440_v15 }
  0x39   : > { %1326 = vmatmul.mubr.f32.vlgmr.msra.gmra.mrb[0].mxu0 %v465_v14 }
  0xa2   : > { %v372_v40 = vpop.xlane.xlu0 %371 }
  0xa3   : > { %890 = vxpose.xlu0.b32.start [1/2] (short) (narrow) %v372_v40, 8 }
  0xa4   : > { %v364_v51 = vpop.xlane.xlu1 %363 }
  0xa6   : > { %v375_v41 = vpop.xlane.xlu0 %374 }
  0xa7   : > { %891 = vxpose.xlu0.b32.end [2/2] (short) (narrow) %v375_v41, 8  ;;  %v988_v41 = vld [vmem:[#allocation3] sm:$0xff] }
  0xa8   : > { %v367_v54 = vpop.xlane.xlu1 %366 }
  0xd0   : > { %1397 = vset.pattern.permute.xlu0 %v1440_v15 }
  0xfa   : > { %v1299_v43 = vpop.f32.mrb[0].mxu1 }
  0xfb   : > { %v552_v44 = vpop.f32.mrb[1].mxu1 }
 0x10c   : > { %v1327_v45 = vpop.f32.mrb[0].mxu0 }
 0x10d   : > { %v1358_v46 = vadd.f32 %v1327_v45, %v1299_v43  ;;  %v880_v47 = vpop.f32.mrb[1].mxu0 }
 0x10e   : > { %v1359_v48 = vadd.f32 %v880_v47, %v552_v44  ;;  %v989_v44 = vld [vmem:[#allocation3 + $0x8] sm:$0xff] }
 0x10f   : > { %v929_v56 = vmul.f32 2.0, %v1358_v46 }
 0x110   : > { %v928_v57 = vmul.f32 2.0, %v1359_v48 }
 0x123   : > { %v906_v53 = vpop.trf.xlu0 }
 0x124   : > { %v925_v55 = vrot.slane %v906_v53, %v924_v52 }
 0x126   : > { %v926_v58 = vadd.f32 %v925_v55, %v364_v51  ;;  %v927_v59 = vadd.f32 %v925_v55, %v367_v54  ;;  %v1003_v54 = vld [vmem:[#allocation4] sm:$0xff]  ;;  %v1004_v55 = vld [vmem:[#allocation4 + $0x8] sm:$0xff] }
 0x128   : > { %v930_v60 = vsub.f32 %v926_v58, %v928_v57  ;;  %v931_v61 = vsub.f32 %v927_v59, %v929_v56 }
 0x12a   : > { %v932_v62 = vmax.f32 %v930_v60, 0.0  ;;  %v933_v63 = vmax.f32 %v931_v61, 0.0 }
 0x12c   : > { %1399 = vrsqrt.f32 %v933_v63  ;;  %vm943_vm2 = vcmp.eq.f32.partialorder %v933_v63, inf  ;;  %vm936_vm3 = vcmp.eq.f32.partialorder %v932_v62, inf  ;;  %v939_v5 = vand.u32 2147483648, %v932_v62 }
 0x12d   : > { %1401 = vrsqrt.f32 %v932_v62  ;;  %v946_v7 = vand.u32 2147483648, %v933_v63  ;;  %vm938_vm4 = vcmp.eq.f32.partialorder %v932_v62, 0.0  ;;  %vm945_vm5 = vcmp.eq.f32.partialorder %v933_v63, 0.0 }
 0x136   : > { %v1400_v0 = vpop.eup %1399 }
 0x137   : > { %v1402_v1 = vpop.eup %1401  ;;  %v942_v2 = vmul.f32 %v1400_v0, %v933_v63 }
 0x138   : > { %v935_v3 = vmul.f32 %v1402_v1, %v932_v62 }
 0x139   : > { %v944_v6 = vsel %vm943_vm2, %v933_v63, %v942_v2 }
 0x13a   : > { %v937_v8 = vsel %vm936_vm3, %v932_v62, %v935_v3  ;;  %v947_v10 = vsel %vm945_vm5, %v946_v7, %v944_v6 }
 0x13b   : > { %v940_v9 = vsel %vm938_vm4, %v939_v5, %v937_v8  ;;  %v955_v13 = vsub.f32 %v1251_v4, %v947_v10 }
 0x13c   : > { %v954_v11 = vsub.f32 %v1251_v4, %v940_v9 }
 0x13d   : > { %v961_v14 = vsel %vm361_vm0, %v955_v13, -inf }
 0x13e   : > { %v958_v12 = vsel %vm361_vm0, %v954_v11, -inf }
 0x13f   : > { %959 = vmax.xlane.f32.xlu1 %v958_v12 }
 0x143   : > { %962 = vmax.xlane.f32.xlu1 %v961_v14 }
 0x1cc   : > { %v960_v18 = vpop.xlane.xlu1 %959 }
 0x1cd   : > { %v964_v19 = vmax.f32 %v956_v17, %v960_v18 }
 0x1cf   : > { %v966_v21 = vsub.f32 %v956_v17, %v964_v19  ;;  %1075 = vst.msk [vmem:[#allocation2] sm:$0xff] %vm346_vm1, %v964_v19  ;;  %974 = vperm.xlu1 %1396, %v964_v19  }
 0x1d0   : > { %v963_v22 = vpop.xlane.xlu1 %962 }
 0x1d1   : > { %v965_v23 = vmax.f32 %v957_v20, %v963_v22  ;;  %v968_v35 = vmul.f32 1.442695, %v966_v21 }
 0x1d3   : > { %v967_v24 = vsub.f32 %v957_v20, %v965_v23  ;;  %1076 = vst.msk [vmem:[#allocation2 + $0x8] sm:$0xff] %vm346_vm1, %v965_v23  ;;  %979 = vperm.xlu1 %1396, %v965_v23  }
 0x1d5   : > { %v970_v38 = vmul.f32 1.442695, %v967_v24 }
 0x24e   : > { %v975_v26 = vpop.permute.xlu1 %974 }
 0x24f   : > { %v982_v27 = vsub.f32 %v954_v11, %v975_v26 }
 0x251   : > { %v984_v28 = vmul.f32 1.442695, %v982_v27 }
 0x252   : > { %v980_v29 = vpop.permute.xlu1 %979 }
 0x253   : > { %1403 = vpow2.f32 %v984_v28  ;;  %v983_v30 = vsub.f32 %v955_v13, %v980_v29 }
 0x255   : > { %v986_v31 = vmul.f32 1.442695, %v983_v30 }
 0x257   : > { %1405 = vpow2.f32 %v986_v31 }
 0x258   : > { %1407 = vpow2.f32 %v968_v35 }
 0x259   : > { %1409 = vpow2.f32 %v970_v38 }
 0x25d   : > { %v1404_v32 = vpop.eup %1403 }
 0x25e   : > { %v992_v33 = vsel %vm361_vm0, %v1404_v32, 0.0 }
 0x25f   : > { %993 = vadd.xlane.f32.xlu1 %v992_v33 }
 0x261   : > { %v1406_v34 = vpop.eup %1405 }
 0x262   : > { %v995_v36 = vsel %vm361_vm0, %v1406_v34, 0.0  ;;  %v1017_v37 = vpack.c.bf16 %v1406_v34, %v1404_v32  ;;  %v1408_v39 = vpop.eup %1407 }
 0x263   : > { %996 = vadd.xlane.f32.xlu0 %v995_v36  ;;  %v1410_v40 = vpop.eup %1409  ;;  %v990_v42 = vmul.f32 %v1408_v39, %v988_v41 }
 0x264   : > { %1331 = vmatmul.mubr.msk.bf16.vlgmr.msra.gmra.mrb[4].mxu1 %vm361_vm0, %v1017_v37  ;;  %v991_v46 = vmul.f32 %v1410_v40, %v989_v44 }
 0x270   : > { %1007 = vperm.xlu1 %1396, %v1408_v39  }
 0x274   : > { %1012 = vperm.xlu1 %1396, %v1410_v40  }
 0x2ec   : > { %v994_v43 = vpop.xlane.xlu1 %993 }
 0x2ed   : > { %v998_v45 = vadd.f32 %v994_v43, %v990_v42 }
 0x2ef   : > { %1001 = vst.msk [vmem:[#allocation3] sm:$0xff] %vm346_vm1, %v998_v45 }
 0x2f0   : > { %v997_v47 = vpop.xlane.xlu0 %996  ;;  %v1008_v53 = vpop.permute.xlu1 %1007 }
 0x2f1   : > { %v999_v48 = vadd.f32 %v997_v47, %v991_v46  ;;  %v1015_v57 = vmul.f32 %v1008_v53, %v1003_v54 }
 0x2f3   : > { %1002 = vst.msk [vmem:[#allocation3 + $0x8] sm:$0xff] %vm346_vm1, %v999_v48 }
 0x2f4   : > { %v1013_v56 = vpop.permute.xlu1 %1012 }
 0x2f5   : > { %v1016_v59 = vmul.f32 %v1013_v56, %v1004_v55 }
 0x2f6   : > { %v1082_v49 = vld [vmem:[#allocation3] sm:$0xff] }
 0x2f7   : > { %1411 = vrcp.f32 %v1082_v49 }
 0x2fa   : > { %v1083_v50 = vld [vmem:[#allocation3 + $0x8] sm:$0xff] }
 0x2fb   : > { %1413 = vrcp.f32 %v1083_v50 }
 0x301   : > { %v1412_v51 = vpop.eup %1411 }
 0x302   : > { %1088 = vperm.xlu1 %1396, %v1412_v51  }
 0x305   : > { %v1414_v52 = vpop.eup %1413 }
 0x306   : > { %1093 = vperm.xlu1 %1396, %v1414_v52  }
 0x337   : > { %v1063_v58 = vpop.f32.mrb[4].mxu1 }
 0x338   : > { %v1070_v60 = vadd.f32 %v1063_v58, %v1015_v57  ;;  %v1332_v61 = vpop.f32.mrb[5].mxu1 }
 0x339   : > { %v1066_v62 = vpop.f32.mrb[6].mxu1 }
 0x33a   : > { %1073 = vst.msk [vmem:[#allocation4] sm:$0xff] %vm351_vm6, %v1070_v60  ;;  %v1071_v63 = vadd.f32 %v1066_v62, %v1016_v59  ;;  %v1333_v0 = vpop.f32.mrb[7].mxu1 }
 0x33c   : > { %1074 = vst.msk [vmem:[#allocation4 + $0x8] sm:$0xff] %vm351_vm6, %v1071_v63 }
 0x341   : > { %v1080_v1 = vld [vmem:[#allocation4] sm:$0xff] }
 0x343   : > { %v1081_v4 = vld [vmem:[#allocation4 + $0x8] sm:$0xff] }
 0x381   : > { %v1089_v2 = vpop.permute.xlu1 %1088 }
 0x382   : > { %v1096_v3 = vmul.f32 %v1089_v2, %v1080_v1 }
 0x384   : > { %1098 = vst.msk [vmem:[%s339_s9] sm:$0xff] %vm351_vm6, %v1096_v3 }
 0x385   : > { %v1094_v5 = vpop.permute.xlu1 %1093 }
 0x386   : > { %v1097_v6 = vmul.f32 %v1094_v5, %v1081_v4 }
 0x388   : > { %1099 = vst.msk [vmem:[%s339_s9 + $0x8] sm:$0xff] %vm351_vm6, %v1097_v6 }
 0x389 PF: > { %s14_s17 = sadd.s32 1, %s1437_s17   ;;  %s1552_s15 = smov %s1433_s16 }
 0x38a   : > { %p11_p5 = scmp.ge.s32.totalorder %s14_s17, 4   ;;  %s1553_s16 = smov %s1555_s18 }
 0x38c   :  { %13 = sbr.rel (!%p11_p5) target bundleno = 2 (0x2), region = 83 }

// kernel: model_forward.3
= control target key start
LH: loop header
LB: loop body
LE: loop exit
PB: predicated region body
PF: predicated region fallthrough
CT: control target
= control target key end

     0   :  { %vm79_vm0 = vcmask 261120   ;;  %vm156_vm1 = vcmask 130048   ;;  %vm313_vm2 = vcmask 1043456   ;;  %vm306_vm3 = vcmask 64512   ;;  %s904_s1 = inlined_call_operand.vmem [shape: bf16[32,16], index: 1, kind: input, shape index: {}]   ;;  %s905_s0 = inlined_call_operand.vmem [shape: f32[32,32], index: 0, kind: input, shape index: {}]   ;;  %s906_s3 = inlined_call_operand.vmem [shape: bf16[16,32], index: 3, kind: input, shape index: {}]   ;;  %s907_s5 = inlined_call_operand.vmem [shape: bf16[32,8], index: 5, kind: input, shape index: {}]   ;;  %s908_s9 = inlined_call_operand.vmem [shape: bf16[32,24], index: 9, kind: input, shape index: {}]   ;;  %s909_s2 = inlined_call_operand.vmem [shape: f32[1,16], index: 2, kind: input, shape index: {}]   ;;  %s910_s7 = inlined_call_operand.vmem [shape: bf16[8,1], index: 7, kind: input, shape index: {}]   ;;  %s911_s11 = inlined_call_operand.vmem [shape: bf16[24,16], index: 11, kind: input, shape index: {}]   ;;  %s912_s8 = inlined_call_operand.<no memory space> [shape: f32[1,1], index: 8, kind: input, shape index: {}]   ;;  %s913_s4 = inlined_call_operand.vmem [shape: f32[1,32], index: 4, kind: input, shape index: {}]   ;;  %s914_s13 = inlined_call_operand.vmem [shape: f32[32,32], index: 13, kind: output, shape index: {0}]   ;;  %s915_s6 = inlined_call_operand.vmem [shape: f32[1,8], index: 6, kind: input, shape index: {}]   ;;  %s916_s10 = inlined_call_operand.vmem [shape: f32[1,24], index: 10, kind: input, shape index: {}]   ;;  %s917_s12 = inlined_call_operand.vmem [shape: f32[1,16], index: 12, kind: input, shape index: {}]   ;;  %s918_s15 = inlined_call_operand.vmem [shape: f32[32,16], index: 15, kind: output, shape index: {2}]   ;;  %s919_s14 = inlined_call_operand.vmem [shape: f32[1,32], index: 14, kind: output, shape index: {1}]  }
   0x1   :  { %v668_v0 = vld [vmem:[%s904_s1] sm:$0xff]   ;;  %v669_v1 = vld [vmem:[%s904_s1 + $0x8] sm:$0xff]   ;;  %v802_v5 = vld [vmem:[%s905_s0 + $0x10] sm:$0xff]  ;;  %v21_v31 = vstv %s912_s8  ;;  %vm497_vm4 = vcmask 195584   ;;  %vm398_vm5 = vcmask 253952  }
   0x2   :  { %621 = vmatprep.subr.bf16.mxu0 %v668_v0  ;;  %v790_v2 = vld [vmem:[%s905_s0] sm:$0xff]  ;;  %v795_v3 = vld [vmem:[%s905_s0 + $0x8] sm:$0xff]  ;;  %v807_v6 = vld [vmem:[%s905_s0 + $0x18] sm:$0xff]  ;;  %22 = vst [vmem:[#allocation2] sm:$0x1] %v21_v31 }
   0x3   :  { %622 = vmatpush3.bf16.msra.mxu0 %v668_v0  ;;  %v54_v4 = vpack.c.bf16 %v795_v3, %v790_v2  ;;  %v55_v7 = vpack.c.bf16 %v807_v6, %v802_v5  ;;  %v670_v8 = vld [vmem:[%s906_s3] sm:$0xff]   ;;  %v672_v25 = vld [vmem:[%s907_s5 + $0x8] sm:$0xff]  }
   0x4   :  { %623 = vmatprep.subr.bf16.mxu0 %v669_v1  ;;  %629 = vmatprep.subr.bf16.mxu1 %v670_v8  ;;  %v671_v9 = vld [vmem:[%s907_s5] sm:$0xff]   ;;  %v674_v27 = vld [vmem:[%s908_s9 + $0x8] sm:$0xff]  }
   0x5   :  { %625 = vmatprep.mubr.msk.bf16.mxu0 %vm79_vm0, %v54_v4  ;;  %630 = vmatpush3.bf16.msra.mxu1 %v670_v8  ;;  %v572_v10 = vld [vmem:[%s909_s2] ss:$0 sm:$0xff] }
   0x6   :  { %635 = vmatprep.subr.bf16.mxu1 %v671_v9  ;;  %v673_v26 = vld [vmem:[%s908_s9] sm:$0xff]  }
   0x7   :  { %624 = vmatpush3.bf16.msra.mxu0 %v669_v1  ;;  %v298_v28 = vld [vmem:[%s910_s7] sm:$0xf] }
   0x8   :  { %665 = vmatprep.subr.msk.bf16.mxu0 %vm313_vm2, %v298_v28  ;;  %v315_v29 = vsel %vm313_vm2, %v298_v28, 0  ;;  %v675_v30 = vld [vmem:[%s911_s11] sm:$0xff]  }
   0x9   :  { %v577_v32 = vld [vmem:[%s913_s4] ss:$0 sm:$0xff] }
   0xa   :  { %626 = vmatmul.mubr.msk.bf16.vlgmr.msra.gmra.mrb[0].mxu0 %vm79_vm0, %v55_v7  ;;  %v581_v45 = vld [vmem:[%s915_s6] ss:$0 sm:$0xff] }
   0xb   :  { %644 = vmatpush3.bf16.msra.mxu0 %v315_v29  ;;  %v589_v54 = vld [vmem:[%s916_s10] ss:$0 sm:$0xff] }
   0xc   :  { %657 = vmatprep.subr.bf16.mxu0 %v675_v30 }
  0xdd   :  { %v627_v11 = vpop.f32.mrb[0].mxu0 }
  0xde   :  { %v129_v12 = vadd.f32 %v627_v11, %v572_v10  ;;  %v120_v13 = vpop.f32.mrb[1].mxu0 }
  0xdf   :  { %v121_v14 = vadd.f32 %v572_v10, %v120_v13  ;;  %v628_v15 = vpop.f32.mrb[2].mxu0  ;;  %v586_v13 = vld [vmem:[#allocation2] ss:$0 sm:$0xff] }
  0xe0   :  { %677 = vtanh.f32 %v129_v12  ;;  %v132_v16 = vadd.f32 %v628_v15, %v572_v10  ;;  %v123_v17 = vpop.f32.mrb[3].mxu0 }
  0xe1   :  { %679 = vtanh.f32 %v121_v14  ;;  %v124_v18 = vadd.f32 %v572_v10, %v123_v17 }
  0xe2   :  { %681 = vtanh.f32 %v132_v16 }
  0xe3   :  { %683 = vtanh.f32 %v124_v18 }
  0xea   :  { %v678_v19 = vpop.eup %677 }
  0xeb   :  { %v680_v20 = vpop.eup %679 }
  0xec   :  { %v682_v21 = vpop.eup %681 }
  0xed   :  { %v684_v22 = vpop.eup %683  ;;  %v140_v23 = vpack.c.bf16 %v682_v21, %v678_v19 }
  0xee   :  { %v139_v24 = vpack.c.bf16 %v684_v22, %v680_v20  ;;  %v594_v20 = vld [vmem:[%s917_s12] ss:$0 sm:$0xff] }
  0xf0   :  { %631 = vmatprep.mubr.msk.bf16.mxu1 %vm156_vm1, %v139_v24 }
  0xf1   :  { %632 = vmatmul.mubr.msk.bf16.vlgmr.msra.gmra.mrb[0].mxu1 %vm156_vm1, %v140_v23 }
  0xf2   :  { %636 = vmatpush3.bf16.msra.mxu1 %v671_v9  ;;  %639 = vmatprep.mubr.msk.bf16.mxu1 %vm79_vm0, %v54_v4 }
  0xf3   :  { %637 = vmatprep.subr.bf16.mxu1 %v672_v25 }
  0xf6   :  { %638 = vmatpush3.bf16.msra.mxu1 %v672_v25 }
  0xf7   :  { %649 = vmatprep.subr.bf16.mxu1 %v673_v26 }
  0xf9   :  { %640 = vmatmul.mubr.msk.bf16.vlgmr.msra.gmra.mrb[4].mxu1 %vm79_vm0, %v55_v7 }
  0xfa   :  { %650 = vmatpush3.bf16.msra.mxu1 %v673_v26  ;;  %653 = vmatprep.mubr.msk.bf16.mxu1 %vm79_vm0, %v54_v4 }
  0xfb   :  { %651 = vmatprep.subr.bf16.mxu1 %v674_v27 }
  0xfe   :  { %652 = vmatpush3.bf16.msra.mxu1 %v674_v27 }
 0x101   :  { %654 = vmatmul.mubr.msk.bf16.vlgmr.msra.gmra.mrb[8].mxu1 %vm79_vm0, %v55_v7 }
 0x1c4   :  { %v633_v33 = vpop.f32.mrb[0].mxu1 }
 0x1c5   :  { %v206_v34 = vadd.f32 %v633_v33, %v577_v32  ;;  %v197_v35 = vpop.f32.mrb[1].mxu1 }
 0x1c6   :  { %v198_v36 = vadd.f32 %v577_v32, %v197_v35  ;;  %v634_v37 = vpop.f32.mrb[2].mxu1 }
 0x1c7   :  { %v214_v38 = vadd.f32 %v206_v34, %v802_v5  ;;  %v209_v39 = vadd.f32 %v634_v37, %v577_v32  ;;  %v200_v40 = vpop.f32.mrb[3].mxu1  ;;  %v676_v5 = vld [vmem:[%s911_s11 + $0x8] ss:$0 sps:$4 sm:$0xff]  }
 0x1c8   :  { %v212_v41 = vadd.f32 %v198_v36, %v790_v2  ;;  %v201_v42 = vadd.f32 %v577_v32, %v200_v40  ;;  %v505_v8 = vsel %vm313_vm2, %v676_v5, 0 }
 0x1c9   :  { %218 = vst.msk [vmem:[%s914_s13 + $0x10] sm:$0xff] %vm79_vm0, %v214_v38  ;;  %v215_v43 = vadd.f32 %v209_v39, %v807_v6 }
 0x1ca   :  { %216 = vst.msk [vmem:[%s914_s13] sm:$0xff] %vm79_vm0, %v212_v41  ;;  %v213_v44 = vadd.f32 %v201_v42, %v795_v3 }
 0x1cb   :  { %219 = vst.msk [vmem:[%s914_s13 + $0x18] sm:$0xff] %vm79_vm0, %v215_v43 }
 0x1cc   :  { %217 = vst.msk [vmem:[%s914_s13 + $0x8] sm:$0xff] %vm79_vm0, %v213_v44  ;;  %v641_v46 = vpop.f32.mrb[4].mxu1 }
 0x1cd   :  { %v286_v47 = vadd.f32 %v641_v46, %v581_v45  ;;  %v277_v48 = vpop.f32.mrb[5].mxu1 }
 0x1ce   :  { %v278_v49 = vadd.f32 %v581_v45, %v277_v48  ;;  %v642_v50 = vpop.f32.mrb[6].mxu1 }
 0x1cf   :  { %685 = vtanh.f32 %v286_v47  ;;  %v289_v51 = vadd.f32 %v642_v50, %v581_v45  ;;  %v280_v52 = vpop.f32.mrb[7].mxu1 }
 0x1d0   :  { %687 = vtanh.f32 %v278_v49  ;;  %v281_v53 = vadd.f32 %v581_v45, %v280_v52 }
 0x1d1   :  { %689 = vtanh.f32 %v289_v51 }
 0x1d2   :  { %691 = vtanh.f32 %v281_v53 }
 0x1d4   :  { %v655_v55 = vpop.f32.mrb[8].mxu1 }
 0x1d5   :  { %v466_v56 = vadd.f32 %v655_v55, %v589_v54  ;;  %v457_v57 = vpop.f32.mrb[9].mxu1 }
 0x1d6   :  { %v458_v58 = vadd.f32 %v589_v54, %v457_v57  ;;  %v656_v59 = vpop.f32.mrb[10].mxu1 }
 0x1d7   :  { %693 = vtanh.f32 %v466_v56  ;;  %v469_v60 = vadd.f32 %v656_v59, %v589_v54  ;;  %v460_v61 = vpop.f32.mrb[11].mxu1 }
 0x1d8   :  { %695 = vtanh.f32 %v458_v58  ;;  %v461_v62 = vadd.f32 %v589_v54, %v460_v61 }
 0x1d9   :  { %v686_v63 = vpop.eup %685  ;;  %697 = vtanh.f32 %v469_v60 }
 0x1da   :  { %v688_v0 = vpop.eup %687  ;;  %699 = vtanh.f32 %v461_v62 }
 0x1db   :  { %v690_v1 = vpop.eup %689 }
 0x1dc   :  { %v692_v2 = vpop.eup %691  ;;  %v297_v3 = vpack.c.bf16 %v690_v1, %v686_v63 }
 0x1dd   :  { %v296_v4 = vpack.c.bf16 %v692_v2, %v688_v0 }
 0x1df   :  { %645 = vmatprep.mubr.msk.bf16.mxu0 %vm306_vm3, %v296_v4 }
 0x1e0   :  { %646 = vmatmul.mubr.msk.bf16.vlgmr.msra.gmra.mrb[4].mxu0 %vm306_vm3, %v297_v3 }
 0x1e1   :  { %v694_v6 = vpop.eup %693  ;;  %658 = vmatpush3.bf16.msra.mxu0 %v675_v30 }
 0x1e2   :  { %v696_v7 = vpop.eup %695  ;;  %666 = vmatprep.subr.msk.bf16.mxu0 %vm313_vm2, %v676_v5 }
 0x1e3   :  { %v698_v9 = vpop.eup %697 }
 0x1e4   :  { %v700_v10 = vpop.eup %699  ;;  %v477_v11 = vpack.c.bf16 %v698_v9, %v694_v6 }
 0x1e5   :  { %660 = vmatpush3.bf16.msra.mxu0 %v505_v8  ;;  %v476_v12 = vpack.c.bf16 %v700_v10, %v696_v7 }
 0x1e7   :  { %661 = vmatprep.mubr.msk.bf16.mxu0 %vm497_vm4, %v476_v12 }
 0x1e8   :  { %662 = vmatmul.mubr.msk.bf16.vlgmr.msra.gmra.mrb[8].mxu0 %vm497_vm4, %v477_v11 }
 0x2b3   :  { %v647_v14 = vpop.f32.mrb[4].mxu0 }
 0x2b4   :  { %v351_v15 = vpop.f32.mrb[5].mxu0  ;;  %v360_v24 = vadd.f32 %v647_v14, %v586_v13 }
 0x2b5   :  { %v648_v16 = vpop.f32.mrb[6].mxu0  ;;  %v352_v17 = vadd.f32 %v586_v13, %v351_v15 }
 0x2b6   :  { %v354_v18 = vpop.f32.mrb[7].mxu0  ;;  %v363_v30 = vadd.f32 %v648_v16, %v586_v13 }
 0x2b7   :  { %366 = vxpose.xlu0.b32.start [1/4] (short) (narrow) %v352_v17, 8  ;;  %v355_v19 = vadd.f32 %v586_v13, %v354_v18 }
 0x2bb   :  { %367 = vxpose.xlu0.b32.cont [2/4] (short) (narrow) %v355_v19, 8  ;;  %v663_v21 = vpop.f32.mrb[8].mxu0 }
 0x2bc   :  { %v550_v22 = vadd.f32 %v663_v21, %v594_v20  ;;  %v541_v23 = vpop.f32.mrb[9].mxu0 }
 0x2bd   :  { %v542_v25 = vadd.f32 %v594_v20, %v541_v23  ;;  %v664_v26 = vpop.f32.mrb[10].mxu0 }
 0x2be   :  { %558 = vst.msk [vmem:[%s918_s15 + $0x10] sm:$0xff] %vm156_vm1, %v550_v22  ;;  %v553_v27 = vadd.f32 %v664_v26, %v594_v20  ;;  %v544_v28 = vpop.f32.mrb[11].mxu0 }
 0x2bf   :  { %368 = vxpose.xlu0.b32.cont [3/4] (short) (narrow) %v360_v24, 8  ;;  %556 = vst.msk [vmem:[%s918_s15] sm:$0xff] %vm156_vm1, %v542_v25  ;;  %v545_v29 = vadd.f32 %v594_v20, %v544_v28 }
 0x2c0   :  { %559 = vst.msk [vmem:[%s918_s15 + $0x18] sm:$0xff] %vm156_vm1, %v553_v27 }
 0x2c1   :  { %557 = vst.msk [vmem:[%s918_s15 + $0x8] sm:$0xff] %vm156_vm1, %v545_v29 }
 0x2c3   :  { %369 = vxpose.xlu0.b32.end [4/4] (short) (narrow) %v363_v30, 8 }
 0x337   :  { %v382_v31 = vpop.trf.xlu0 }
 0x338   :  { %399 = vst.msk [vmem:[%s919_s14] sm:$0x1] %vm398_vm5, %v382_v31 }

</bundles_post_ra>
